<compile_context>
chip_gen: v5e
topology: v5e:2x2
jax: 0.10.0
libtpu: 0.0.40
codegen_flags: <defaults>
</compile_context>

<pallas_src>
import functools

import jax
import jax.numpy as jnp
from jax.experimental import pallas as pl
from jax.experimental.pallas import tpu as pltpu


# Scoped-VMEM budget: headroom under v7x's 64 MiB physical, well under the
# 128 MiB of v5e/v6e.
_VMEM_LIMIT_BYTES = 48 * 1024 * 1024


# ----------------------------- fused decoder-block kernel -----------------------------

def _decoder_block_kernel(xq_ref, xfull_ref, enc_ref, tbias_ref, sbias_ref,
                          sa_w_ref, sa_b_ref, n0_g_ref, n0_b_ref,
                          ca_w_ref, ca_b_ref, n1_g_ref, n1_b_ref,
                          ff1_w_ref, ff1_b_ref, ff2_w_ref, ff2_b_ref,
                          n2_g_ref, n2_b_ref,
                          o_ref,
                          *, heads, scale, eps):
    """One (batch, query-row-tile) step of a full DecoderBlock."""
    xq = xq_ref[0].astype(jnp.float32)        # (tq, E)  query rows
    xfull = xfull_ref[0].astype(jnp.float32)  # (Lq, E)  full x (self-attn K/V)
    enc = enc_ref[0].astype(jnp.float32)      # (Lk, E)  full enc (cross K/V)
    tbias = tbias_ref[0].astype(jnp.float32)  # (tq, Lq) additive mask bias
    sbias = sbias_ref[0].astype(jnp.float32)  # (tq, Lk)

    E = xq.shape[-1]
    hd = E // heads

    def mha(q, kv, bias):
        # Multi-head attention with NO Q/K/V projections (reference quirk).
        # Heads are static lane slices; per-head outputs are assembled once
        # with a lane-dense concatenate (no masked partial stores).
        q_s = (q * scale).astype(jnp.bfloat16)   # fold 1/sqrt(E) into q
        kv_b = kv.astype(jnp.bfloat16)
        outs = []
        for h in range(heads):
            qh = q_s[:, h * hd:(h + 1) * hd]     # (tq, hd)
            kh = kv_b[:, h * hd:(h + 1) * hd]    # (Lk, hd)  keys == values
            energy = jax.lax.dot_general(
                qh, kh, (((1,), (1,)), ((), ())),
                preferred_element_type=jnp.float32)          # (tq, Lk)
            energy = energy + bias                           # additive mask
            energy = energy - jnp.max(energy, axis=-1, keepdims=True)
            p = jnp.exp(energy)
            p = p * pl.reciprocal(jnp.sum(p, axis=-1, keepdims=True),
                                  approx=True)
            outs.append(jnp.dot(p.astype(jnp.bfloat16), kh,
                                preferred_element_type=jnp.float32))
        return jnp.concatenate(outs, axis=-1)                 # (tq, E)

    def linear(a, w_ref, b_ref, relu=False):
        # Weights are already bf16-resident; f32 accumulation on the MXU.
        y = jnp.dot(a.astype(jnp.bfloat16), w_ref[...],
                    preferred_element_type=jnp.float32)
        y = y + b_ref[...]
        if relu:
            y = jnp.maximum(y, 0.0)
        return y

    def add_ln(a, b, g_ref, bb_ref):
        z = a + b
        mean = jnp.mean(z, axis=-1, keepdims=True)
        var = jnp.mean((z - mean) ** 2, axis=-1, keepdims=True)
        zn = (z - mean) * jax.lax.rsqrt(var + eps)
        return zn * g_ref[...] + bb_ref[...]

    # ---- DecoderBlock: self-attention + norm (dropout = identity) ----
    att = mha(xq, xfull, tbias)
    att = linear(att, sa_w_ref, sa_b_ref)
    query = add_ln(att, xq, n0_g_ref, n0_b_ref)

    # ---- TransformerBlock: cross-attention + norm1 ----
    att2 = mha(query, enc, sbias)
    att2 = linear(att2, ca_w_ref, ca_b_ref)
    xb = add_ln(att2, query, n1_g_ref, n1_b_ref)

    # ---- feed-forward + norm2 ----
    h = linear(xb, ff1_w_ref, ff1_b_ref, relu=True)
    h = linear(h, ff2_w_ref, ff2_b_ref)
    out = add_ln(h, xb, n2_g_ref, n2_b_ref)

    o_ref[0] = out.astype(o_ref.dtype)


def _pick_q_tile(Lq):
    # Full Lq if small; otherwise a multiple of 16 (bf16-sublane friendly).
    # TODO(synk): prefer 128 on v5e, 256 on v6e/v7x once generation is plumbed.
    if Lq <= 256:
        return Lq
    for cand in (256, 128, 64, 32, 16):
        if Lq % cand == 0:
            return cand
    return Lq


def decoder_block_forward(p, x, enc_out, tbias, sbias, embed_size, heads):
    """x: (N, Lq, E) f32; enc_out: (N, Lk, E) f32; biases bf16 additive masks."""
    N, Lq, E = x.shape
    Lk = enc_out.shape[1]
    FE = p["ff1_w"].shape[1]
    assert E % heads == 0, "Embed size needs to be divisible by heads"
    scale = 1.0 / (embed_size ** 0.5)
    tq = _pick_q_tile(Lq)

    kernel = functools.partial(_decoder_block_kernel,
                               heads=heads, scale=scale, eps=1e-5)
    const2d = lambda b, q: (0, 0)   # grid-invariant weights: fetched once

    flops = int(4 * N * Lq * (Lq + Lk) * E
                + 4 * N * Lq * (E * E + E * FE))
    transcendentals = int(N * Lq * (Lq + Lk) + 6 * N * Lq)
    bytes_accessed = int(4 * (x.size + enc_out.size + 2 * N * Lq * E)
                         + 2 * (tbias.size + sbias.size)
                         + 2 * (2 * E * E + 2 * E * FE)
                         + 4 * (8 * E + FE))

    return pl.pallas_call(
        kernel,
        out_shape=jax.ShapeDtypeStruct((N, Lq, E), jnp.float32),
        grid=(N, Lq // tq),
        in_specs=[
            pl.BlockSpec((1, tq, E), lambda b, q: (b, q, 0)),   # x query rows
            pl.BlockSpec((1, Lq, E), lambda b, q: (b, 0, 0)),   # x full (K/V)
            pl.BlockSpec((1, Lk, E), lambda b, q: (b, 0, 0)),   # enc_out (K/V)
            pl.BlockSpec((1, tq, Lq), lambda b, q: (b, q, 0)),  # trg bias rows
            pl.BlockSpec((1, tq, Lk), lambda b, q: (b, q, 0)),  # src bias rows
            pl.BlockSpec((E, E), const2d),                      # self-attn fc_w (bf16)
            pl.BlockSpec((1, E), const2d),                      # self-attn fc_b
            pl.BlockSpec((1, E), const2d),                      # norm  gamma
            pl.BlockSpec((1, E), const2d),                      # norm  beta
            pl.BlockSpec((E, E), const2d),                      # cross-attn fc_w (bf16)
            pl.BlockSpec((1, E), const2d),                      # cross-attn fc_b
            pl.BlockSpec((1, E), const2d),                      # norm1 gamma
            pl.BlockSpec((1, E), const2d),                      # norm1 beta
            pl.BlockSpec((E, FE), const2d),                     # ff1 w (bf16)
            pl.BlockSpec((1, FE), const2d),                     # ff1 b
            pl.BlockSpec((FE, E), const2d),                     # ff2 w (bf16)
            pl.BlockSpec((1, E), const2d),                      # ff2 b
            pl.BlockSpec((1, E), const2d),                      # norm2 gamma
            pl.BlockSpec((1, E), const2d),                      # norm2 beta
        ],
        out_specs=pl.BlockSpec((1, tq, E), lambda b, q: (b, q, 0)),
        compiler_params=pltpu.CompilerParams(
            dimension_semantics=("parallel", "parallel"),
            vmem_limit_bytes=_VMEM_LIMIT_BYTES),
        cost_estimate=pl.CostEstimate(flops=flops,
                                      transcendentals=transcendentals,
                                      bytes_accessed=bytes_accessed),
    )(x, x, enc_out, tbias, sbias,
      p["sa_fc_w"], p["sa_fc_b"].reshape(1, E),
      p["norm_g"].reshape(1, E), p["norm_b"].reshape(1, E),
      p["ca_fc_w"], p["ca_fc_b"].reshape(1, E),
      p["norm1_g"].reshape(1, E), p["norm1_b"].reshape(1, E),
      p["ff1_w"], p["ff1_b"].reshape(1, FE),
      p["ff2_w"], p["ff2_b"].reshape(1, E),
      p["norm2_g"].reshape(1, E), p["norm2_b"].reshape(1, E))


# ----------------------------- tiled, lane-dense vocab projection -----------------------------

def _linear_kernel(x_ref, w_ref, b_ref, o_ref):
    y = jnp.dot(x_ref[...].astype(jnp.bfloat16), w_ref[...],
                preferred_element_type=jnp.float32)
    o_ref[...] = (y + b_ref[...]).astype(o_ref.dtype)


def _pick_row_tile(M):
    for cand in (512, 256, 128, 64, 32, 16, 8):
        if M % cand == 0 and M // cand >= 2:
            return cand
    return M


def _pick_col_tile(Npad):
    for cand in (2048, 1024, 512, 256, 128):
        if Npad % cand == 0:
            return cand
    return Npad


def linear_lane_dense(x2d, w_bf16, b):
    """x2d: (M, K) f32; w_bf16: (K, V) bf16; b: (V,) f32.

    Output columns are padded to a 128-lane multiple inside the kernel
    (unmasked stores) and tiled over both rows and vocab columns so the
    resident weight tile stays small (v7x 64 MiB VMEM safe)."""
    M, K = x2d.shape
    Nout = w_bf16.shape[1]
    Npad = ((Nout + 127) // 128) * 128
    if Npad != Nout:
        w_bf16 = jnp.pad(w_bf16, ((0, 0), (0, Npad - Nout)))
        b = jnp.pad(b, ((0, Npad - Nout),))
    tm = _pick_row_tile(M)
    tn = _pick_col_tile(Npad)

    flops = 2 * M * K * Npad
    bytes_accessed = int(4 * M * K + 2 * K * Npad + 4 * Npad + 4 * M * Npad)

    out = pl.pallas_call(
        _linear_kernel,
        out_shape=jax.ShapeDtypeStruct((M, Npad), jnp.float32),
        grid=(M // tm, Npad // tn),
        in_specs=[
            pl.BlockSpec((tm, K), lambda i, j: (i, 0)),
            pl.BlockSpec((K, tn), lambda i, j: (0, j)),
            pl.BlockSpec((1, tn), lambda i, j: (0, j)),
        ],
        out_specs=pl.BlockSpec((tm, tn), lambda i, j: (i, j)),
        compiler_params=pltpu.CompilerParams(
            dimension_semantics=("parallel", "parallel"),
            vmem_limit_bytes=_VMEM_LIMIT_BYTES),
        cost_estimate=pl.CostEstimate(flops=flops, transcendentals=0,
                                      bytes_accessed=bytes_accessed),
    )(x2d, w_bf16, b.reshape(1, Npad))
    return out[:, :Nout]


# ----------------------------- model (forward) -----------------------------

def decoder_forward(params, tokens, enc_out, src_mask, trg_mask,
                    embed_size, heads):
    N, L = tokens.shape
    # TODO(synk): embedding gathers are tiny indexed lookups -- left to XLA glue.
    positions = jnp.arange(L, dtype=jnp.int32)
    h = params["word_emb"][tokens] + params["pos_emb"][positions][None, :, :]

    # Pre-build additive mask biases once (shared by every layer): halves the
    # per-layer mask DMA vs int32 and removes the compare+select from the VALU.
    neg = jnp.float32(-1e20)
    tbias = jnp.where(trg_mask == 0, neg, 0.0).astype(jnp.bfloat16)
    sbias = jnp.where(src_mask == 0, neg, 0.0).astype(jnp.bfloat16)

    for lp in params["layers"]:
        h = decoder_block_forward(lp, h, enc_out, tbias, sbias,
                                  embed_size, heads)
    vocab = params["fc_out_w"].shape[1]
    out = linear_lane_dense(h.reshape(N * L, embed_size),
                            params["fc_out_w"],
                            params["fc_out_b"]).reshape(N, L, vocab)
    return out


# ----------------------------- parameter init -----------------------------

def init_params(key, trg_vocab_size, embed_size, num_layers, heads,
                forward_expansion, max_length):
    def nrm(k, shape, scale=0.02):
        return (scale * jax.random.normal(k, shape)).astype(jnp.float32)

    keys = iter(jax.random.split(key, 8 + num_layers * 8))
    E = embed_size
    FE = forward_expansion * embed_size

    # TODO(synk): the reference SelfAttention also declares per-head Q/K/V
    # Linear layers but never uses them in forward; they are omitted here.
    # Matmul weights are stored bf16 (MXU operand dtype); the kernel keeps
    # f32 accumulation, so this matches the previous in-kernel downcast.
    layers = []
    for _ in range(num_layers):
        layers.append({
            "sa_fc_w": nrm(next(keys), (E, E)).astype(jnp.bfloat16),
            "sa_fc_b": jnp.zeros((E,), jnp.float32),
            "norm_g": jnp.ones((E,), jnp.float32),
            "norm_b": jnp.zeros((E,), jnp.float32),
            "ca_fc_w": nrm(next(keys), (E, E)).astype(jnp.bfloat16),
            "ca_fc_b": jnp.zeros((E,), jnp.float32),
            "norm1_g": jnp.ones((E,), jnp.float32),
            "norm1_b": jnp.zeros((E,), jnp.float32),
            "ff1_w": nrm(next(keys), (E, FE)).astype(jnp.bfloat16),
            "ff1_b": jnp.zeros((FE,), jnp.float32),
            "ff2_w": nrm(next(keys), (FE, E)).astype(jnp.bfloat16),
            "ff2_b": jnp.zeros((E,), jnp.float32),
            "norm2_g": jnp.ones((E,), jnp.float32),
            "norm2_b": jnp.zeros((E,), jnp.float32),
        })

    return {
        "word_emb": nrm(next(keys), (trg_vocab_size, E), scale=1.0),
        "pos_emb": nrm(next(keys), (max_length, E), scale=1.0),
        "layers": layers,
        "fc_out_w": nrm(next(keys), (E, trg_vocab_size)).astype(jnp.bfloat16),
        "fc_out_b": jnp.zeros((trg_vocab_size,), jnp.float32),
    }


# ----------------------------- main -----------------------------

if __name__ == "__main__":
    trg_vocab_size = 64
    embed_size = 32
    num_layers = 2
    heads = 4
    forward_expansion = 4
    max_length = 16

    N = 2
    trg_len = 8
    src_len = 8

    root = jax.random.PRNGKey(0)
    k_params, k_tok, k_enc = jax.random.split(root, 3)

    params = init_params(k_params, trg_vocab_size, embed_size, num_layers,
                         heads, forward_expansion, max_length)

    tokens = jax.random.randint(k_tok, (N, trg_len), 0, trg_vocab_size,
                                dtype=jnp.int32)
    enc_out = jax.random.normal(k_enc, (N, src_len, embed_size),
                                dtype=jnp.float32)

    # trg_mask: causal (N, Lq, Lq); src_mask: all-visible (N, Lq, Lk_src)
    trg_mask = jnp.tril(jnp.ones((trg_len, trg_len), jnp.int32))[None, :, :]
    trg_mask = jnp.broadcast_to(trg_mask, (N, trg_len, trg_len))
    src_mask = jnp.ones((N, trg_len, src_len), jnp.int32)

    fwd = jax.jit(functools.partial(decoder_forward,
                                    embed_size=embed_size, heads=heads))
    out = fwd(params, tokens, enc_out, src_mask, trg_mask)
    out = jax.block_until_ready(out)

    assert out.shape == (N, trg_len, trg_vocab_size)
    assert bool(jnp.all(jnp.isfinite(out)))
    print("KERNEL_OK")
</pallas_src>

<mosaic_0001>
module attributes {stable_mosaic.version = 11 : i64} {
  func.func @_linear_kernel(%arg0: i32, %arg1: i32, %arg2: memref<8x32xf32, #tpu.memory_space<vmem>>, %arg3: memref<32x128xbf16, #tpu.memory_space<vmem>>, %arg4: memref<1x128xf32, #tpu.memory_space<vmem>>, %arg5: memref<8x128xf32, #tpu.memory_space<vmem>>) attributes {dimension_semantics = [#tpu.dimension_semantics<parallel>, #tpu.dimension_semantics<parallel>], iteration_bounds = array<i64: 2, 1>, scalar_prefetch = 0 : i64, scratch_operands = 0 : i64, tpu.core_type = #tpu.core_type<tc>, window_params = [{transform_indices = @transform_0, window_bounds = array<i64: 8, 32>}, {transform_indices = @transform_1, window_bounds = array<i64: 32, 128>}, {transform_indices = @transform_2, window_bounds = array<i64: 1, 128>}, {transform_indices = @transform_3, window_bounds = array<i64: 8, 128>}]} {
    %c0 = arith.constant 0 : index
    %c0_0 = arith.constant 0 : index
    %0 = vector.load %arg2[%c0, %c0_0] : memref<8x32xf32, #tpu.memory_space<vmem>>, vector<8x32xf32>
    %1 = arith.truncf %0 : vector<8x32xf32> to vector<8x32xbf16>
    %c0_1 = arith.constant 0 : index
    %c0_2 = arith.constant 0 : index
    %2 = vector.load %arg3[%c0_1, %c0_2] : memref<32x128xbf16, #tpu.memory_space<vmem>>, vector<32x128xbf16>
    %cst = arith.constant dense<0.000000e+00> : vector<8x128xf32>
    %3 = tpu.matmul %1, %2, %cst {dimension_numbers = #tpu.dot_dimension_numbers<[1], [0], [0], [1], [0, 0, 1, 1], [], []>} : vector<8x32xbf16>, vector<32x128xbf16>, vector<8x128xf32> -> vector<8x128xf32>
    %c0_3 = arith.constant 0 : index
    %c0_4 = arith.constant 0 : index
    %4 = vector.load %arg4[%c0_3, %c0_4] : memref<1x128xf32, #tpu.memory_space<vmem>>, vector<1x128xf32>
    %5 = vector.broadcast %4 : vector<1x128xf32> to vector<8x128xf32>
    %6 = arith.addf %3, %5 : vector<8x128xf32>
    %c0_5 = arith.constant 0 : index
    %c0_6 = arith.constant 0 : index
    %7 = vector.load %arg5[%c0_5, %c0_6] : memref<8x128xf32, #tpu.memory_space<vmem>>, vector<8x128xf32>
    tpu.vector_store %arg5[%c0_5, %c0_6], %6 {strides = array<i32>} : memref<8x128xf32, #tpu.memory_space<vmem>>, vector<8x128xf32>,
    return
  }
  func.func @transform_0(%arg0: i32, %arg1: i32) -> (i32, i32) {
    %c0_i32 = arith.constant 0 : i32
    %c0_i32_0 = arith.constant 0 : i32
    return %arg0, %c0_i32 : i32, i32
  }
  func.func @transform_1(%arg0: i32, %arg1: i32) -> (i32, i32) {
    %c0_i32 = arith.constant 0 : i32
    %c0_i32_0 = arith.constant 0 : i32
    return %c0_i32, %arg1 : i32, i32
  }
  func.func @transform_2(%arg0: i32, %arg1: i32) -> (i32, i32) {
    %c0_i32 = arith.constant 0 : i32
    %c0_i32_0 = arith.constant 0 : i32
    return %c0_i32, %arg1 : i32, i32
  }
  func.func @transform_3(%arg0: i32, %arg1: i32) -> (i32, i32) {
    %c0_i32 = arith.constant 0 : i32
    return %arg0, %arg1 : i32, i32
  }
}

module attributes {stable_mosaic.version = 11 : i64} {
  func.func @_decoder_block_kernel(%arg0: i32, %arg1: i32, %arg2: memref<1x8x32xf32, #tpu.memory_space<vmem>>, %arg3: memref<1x8x32xf32, #tpu.memory_space<vmem>>, %arg4: memref<1x8x32xf32, #tpu.memory_space<vmem>>, %arg5: memref<1x8x8xbf16, #tpu.memory_space<vmem>>, %arg6: memref<1x8x8xbf16, #tpu.memory_space<vmem>>, %arg7: memref<32x32xbf16, #tpu.memory_space<vmem>>, %arg8: memref<1x32xf32, #tpu.memory_space<vmem>>, %arg9: memref<1x32xf32, #tpu.memory_space<vmem>>, %arg10: memref<1x32xf32, #tpu.memory_space<vmem>>, %arg11: memref<32x32xbf16, #tpu.memory_space<vmem>>, %arg12: memref<1x32xf32, #tpu.memory_space<vmem>>, %arg13: memref<1x32xf32, #tpu.memory_space<vmem>>, %arg14: memref<1x32xf32, #tpu.memory_space<vmem>>, %arg15: memref<32x128xbf16, #tpu.memory_space<vmem>>, %arg16: memref<1x128xf32, #tpu.memory_space<vmem>>, %arg17: memref<128x32xbf16, #tpu.memory_space<vmem>>, %arg18: memref<1x32xf32, #tpu.memory_space<vmem>>, %arg19: memref<1x32xf32, #tpu.memory_space<vmem>>, %arg20: memref<1x32xf32, #tpu.memory_space<vmem>>, %arg21: memref<1x8x32xf32, #tpu.memory_space<vmem>>) attributes {dimension_semantics = [#tpu.dimension_semantics<parallel>, #tpu.dimension_semantics<parallel>], iteration_bounds = array<i64: 2, 1>, scalar_prefetch = 0 : i64, scratch_operands = 0 : i64, tpu.core_type = #tpu.core_type<tc>, window_params = [{transform_indices = @transform_0, window_bounds = array<i64: 1, 8, 32>}, {transform_indices = @transform_1, window_bounds = array<i64: 1, 8, 32>}, {transform_indices = @transform_2, window_bounds = array<i64: 1, 8, 32>}, {transform_indices = @transform_3, window_bounds = array<i64: 1, 8, 8>}, {transform_indices = @transform_4, window_bounds = array<i64: 1, 8, 8>}, {pipeline_mode = #tpu.pipeline_mode<synchronous>, transform_indices = @transform_5, window_bounds = array<i64: 32, 32>}, {pipeline_mode = #tpu.pipeline_mode<synchronous>, transform_indices = @transform_6, window_bounds = array<i64: 1, 32>}, {pipeline_mode = #tpu.pipeline_mode<synchronous>, transform_indices = @transform_7, window_bounds = array<i64: 1, 32>}, {pipeline_mode = #tpu.pipeline_mode<synchronous>, transform_indices = @transform_8, window_bounds = array<i64: 1, 32>}, {pipeline_mode = #tpu.pipeline_mode<synchronous>, transform_indices = @transform_9, window_bounds = array<i64: 32, 32>}, {pipeline_mode = #tpu.pipeline_mode<synchronous>, transform_indices = @transform_10, window_bounds = array<i64: 1, 32>}, {pipeline_mode = #tpu.pipeline_mode<synchronous>, transform_indices = @transform_11, window_bounds = array<i64: 1, 32>}, {pipeline_mode = #tpu.pipeline_mode<synchronous>, transform_indices = @transform_12, window_bounds = array<i64: 1, 32>}, {pipeline_mode = #tpu.pipeline_mode<synchronous>, transform_indices = @transform_13, window_bounds = array<i64: 32, 128>}, {pipeline_mode = #tpu.pipeline_mode<synchronous>, transform_indices = @transform_14, window_bounds = array<i64: 1, 128>}, {pipeline_mode = #tpu.pipeline_mode<synchronous>, transform_indices = @transform_15, window_bounds = array<i64: 128, 32>}, {pipeline_mode = #tpu.pipeline_mode<synchronous>, transform_indices = @transform_16, window_bounds = array<i64: 1, 32>}, {pipeline_mode = #tpu.pipeline_mode<synchronous>, transform_indices = @transform_17, window_bounds = array<i64: 1, 32>}, {pipeline_mode = #tpu.pipeline_mode<synchronous>, transform_indices = @transform_18, window_bounds = array<i64: 1, 32>}, {transform_indices = @transform_19, window_bounds = array<i64: 1, 8, 32>}]} {
    %c0 = arith.constant 0 : index
    %c0_0 = arith.constant 0 : index
    %c0_1 = arith.constant 0 : index
    %0 = vector.load %arg2[%c0, %c0_0, %c0_1] : memref<1x8x32xf32, #tpu.memory_space<vmem>>, vector<1x8x32xf32>
    %1 = vector.shape_cast %0 : vector<1x8x32xf32> to vector<8x32xf32>
    %c0_2 = arith.constant 0 : index
    %c0_3 = arith.constant 0 : index
    %c0_4 = arith.constant 0 : index
    %2 = vector.load %arg3[%c0_2, %c0_3, %c0_4] : memref<1x8x32xf32, #tpu.memory_space<vmem>>, vector<1x8x32xf32>
    %3 = vector.shape_cast %2 : vector<1x8x32xf32> to vector<8x32xf32>
    %c0_5 = arith.constant 0 : index
    %c0_6 = arith.constant 0 : index
    %c0_7 = arith.constant 0 : index
    %4 = vector.load %arg4[%c0_5, %c0_6, %c0_7] : memref<1x8x32xf32, #tpu.memory_space<vmem>>, vector<1x8x32xf32>
    %5 = vector.shape_cast %4 : vector<1x8x32xf32> to vector<8x32xf32>
    %c0_8 = arith.constant 0 : index
    %c0_9 = arith.constant 0 : index
    %c0_10 = arith.constant 0 : index
    %6 = vector.load %arg5[%c0_8, %c0_9, %c0_10] : memref<1x8x8xbf16, #tpu.memory_space<vmem>>, vector<1x8x8xbf16>
    %7 = vector.shape_cast %6 : vector<1x8x8xbf16> to vector<8x8xbf16>
    %8 = arith.extf %7 : vector<8x8xbf16> to vector<8x8xf32>
    %c0_11 = arith.constant 0 : index
    %c0_12 = arith.constant 0 : index
    %c0_13 = arith.constant 0 : index
    %9 = vector.load %arg6[%c0_11, %c0_12, %c0_13] : memref<1x8x8xbf16, #tpu.memory_space<vmem>>, vector<1x8x8xbf16>
    %10 = vector.shape_cast %9 : vector<1x8x8xbf16> to vector<8x8xbf16>
    %11 = arith.extf %10 : vector<8x8xbf16> to vector<8x8xf32>
    %cst = arith.constant 0.176776692 : f32
    %12 = vector.broadcast %cst : f32 to vector<8x32xf32>
    %13 = arith.mulf %1, %12 : vector<8x32xf32>
    %14 = arith.truncf %13 : vector<8x32xf32> to vector<8x32xbf16>
    %15 = arith.truncf %3 : vector<8x32xf32> to vector<8x32xbf16>
    %16 = vector.extract_strided_slice %14 {offsets = [0, 0], sizes = [8, 8], strides = [1, 1]} : vector<8x32xbf16> to vector<8x8xbf16>
    %17 = vector.extract_strided_slice %15 {offsets = [0, 0], sizes = [8, 8], strides = [1, 1]} : vector<8x32xbf16> to vector<8x8xbf16>
    %cst_14 = arith.constant dense<0.000000e+00> : vector<8x8xf32>
    %18 = tpu.matmul %16, %17, %cst_14 {dimension_numbers = #tpu.dot_dimension_numbers<[1], [1], [0], [0], [0, 0, 1, 0], [], []>} : vector<8x8xbf16>, vector<8x8xbf16>, vector<8x8xf32> -> vector<8x8xf32>
    %19 = arith.addf %18, %8 : vector<8x8xf32>
    %cst_15 = arith.constant dense<0xFF800000> : vector<8xf32>
    %20 = vector.multi_reduction <maximumf>, %19, %cst_15 [1] : vector<8x8xf32> to vector<8xf32>
    %21 = vector.shape_cast %20 : vector<8xf32> to vector<8x1xf32>
    %22 = vector.broadcast %21 : vector<8x1xf32> to vector<8x8xf32>
    %23 = arith.subf %19, %22 : vector<8x8xf32>
    %24 = math.exp %23 : vector<8x8xf32>
    %cst_16 = arith.constant dense<0.000000e+00> : vector<8xf32>
    %25 = vector.multi_reduction <add>, %24, %cst_16 [1] : vector<8x8xf32> to vector<8xf32>
    %26 = vector.shape_cast %25 : vector<8xf32> to vector<8x1xf32>
    %27 = tpu.reciprocal %26 {approx = true} : vector<8x1xf32> -> vector<8x1xf32>
    %28 = vector.broadcast %27 : vector<8x1xf32> to vector<8x8xf32>
    %29 = arith.mulf %24, %28 : vector<8x8xf32>
    %30 = arith.truncf %29 : vector<8x8xf32> to vector<8x8xbf16>
    %cst_17 = arith.constant dense<0.000000e+00> : vector<8x8xf32>
    %31 = tpu.matmul %30, %17, %cst_17 {dimension_numbers = #tpu.dot_dimension_numbers<[1], [0], [0], [1], [0, 0, 1, 1], [], []>} : vector<8x8xbf16>, vector<8x8xbf16>, vector<8x8xf32> -> vector<8x8xf32>
    %32 = vector.extract_strided_slice %14 {offsets = [0, 8], sizes = [8, 8], strides = [1, 1]} : vector<8x32xbf16> to vector<8x8xbf16>
    %33 = vector.extract_strided_slice %15 {offsets = [0, 8], sizes = [8, 8], strides = [1, 1]} : vector<8x32xbf16> to vector<8x8xbf16>
    %cst_18 = arith.constant dense<0.000000e+00> : vector<8x8xf32>
    %34 = tpu.matmul %32, %33, %cst_18 {dimension_numbers = #tpu.dot_dimension_numbers<[1], [1], [0], [0], [0, 0, 1, 0], [], []>} : vector<8x8xbf16>, vector<8x8xbf16>, vector<8x8xf32> -> vector<8x8xf32>
    %35 = arith.addf %34, %8 : vector<8x8xf32>
    %cst_19 = arith.constant dense<0xFF800000> : vector<8xf32>
    %36 = vector.multi_reduction <maximumf>, %35, %cst_19 [1] : vector<8x8xf32> to vector<8xf32>
    %37 = vector.shape_cast %36 : vector<8xf32> to vector<8x1xf32>
    %38 = vector.broadcast %37 : vector<8x1xf32> to vector<8x8xf32>
    %39 = arith.subf %35, %38 : vector<8x8xf32>
    %40 = math.exp %39 : vector<8x8xf32>
    %cst_20 = arith.constant dense<0.000000e+00> : vector<8xf32>
    %41 = vector.multi_reduction <add>, %40, %cst_20 [1] : vector<8x8xf32> to vector<8xf32>
    %42 = vector.shape_cast %41 : vector<8xf32> to vector<8x1xf32>
    %43 = tpu.reciprocal %42 {approx = true} : vector<8x1xf32> -> vector<8x1xf32>
    %44 = vector.broadcast %43 : vector<8x1xf32> to vector<8x8xf32>
    %45 = arith.mulf %40, %44 : vector<8x8xf32>
    %46 = arith.truncf %45 : vector<8x8xf32> to vector<8x8xbf16>
    %cst_21 = arith.constant dense<0.000000e+00> : vector<8x8xf32>
    %47 = tpu.matmul %46, %33, %cst_21 {dimension_numbers = #tpu.dot_dimension_numbers<[1], [0], [0], [1], [0, 0, 1, 1], [], []>} : vector<8x8xbf16>, vector<8x8xbf16>, vector<8x8xf32> -> vector<8x8xf32>
    %48 = vector.extract_strided_slice %14 {offsets = [0, 16], sizes = [8, 8], strides = [1, 1]} : vector<8x32xbf16> to vector<8x8xbf16>
    %49 = vector.extract_strided_slice %15 {offsets = [0, 16], sizes = [8, 8], strides = [1, 1]} : vector<8x32xbf16> to vector<8x8xbf16>
    %cst_22 = arith.constant dense<0.000000e+00> : vector<8x8xf32>
    %50 = tpu.matmul %48, %49, %cst_22 {dimension_numbers = #tpu.dot_dimension_numbers<[1], [1], [0], [0], [0, 0, 1, 0], [], []>} : vector<8x8xbf16>, vector<8x8xbf16>, vector<8x8xf32> -> vector<8x8xf32>
    %51 = arith.addf %50, %8 : vector<8x8xf32>
    %cst_23 = arith.constant dense<0xFF800000> : vector<8xf32>
    %52 = vector.multi_reduction <maximumf>, %51, %cst_23 [1] : vector<8x8xf32> to vector<8xf32>
    %53 = vector.shape_cast %52 : vector<8xf32> to vector<8x1xf32>
    %54 = vector.broadcast %53 : vector<8x1xf32> to vector<8x8xf32>
    %55 = arith.subf %51, %54 : vector<8x8xf32>
    %56 = math.exp %55 : vector<8x8xf32>
    %cst_24 = arith.constant dense<0.000000e+00> : vector<8xf32>
    %57 = vector.multi_reduction <add>, %56, %cst_24 [1] : vector<8x8xf32> to vector<8xf32>
    %58 = vector.shape_cast %57 : vector<8xf32> to vector<8x1xf32>
    %59 = tpu.reciprocal %58 {approx = true} : vector<8x1xf32> -> vector<8x1xf32>
    %60 = vector.broadcast %59 : vector<8x1xf32> to vector<8x8xf32>
    %61 = arith.mulf %56, %60 : vector<8x8xf32>
    %62 = arith.truncf %61 : vector<8x8xf32> to vector<8x8xbf16>
    %cst_25 = arith.constant dense<0.000000e+00> : vector<8x8xf32>
    %63 = tpu.matmul %62, %49, %cst_25 {dimension_numbers = #tpu.dot_dimension_numbers<[1], [0], [0], [1], [0, 0, 1, 1], [], []>} : vector<8x8xbf16>, vector<8x8xbf16>, vector<8x8xf32> -> vector<8x8xf32>
    %64 = vector.extract_strided_slice %14 {offsets = [0, 24], sizes = [8, 8], strides = [1, 1]} : vector<8x32xbf16> to vector<8x8xbf16>
    %65 = vector.extract_strided_slice %15 {offsets = [0, 24], sizes = [8, 8], strides = [1, 1]} : vector<8x32xbf16> to vector<8x8xbf16>
    %cst_26 = arith.constant dense<0.000000e+00> : vector<8x8xf32>
    %66 = tpu.matmul %64, %65, %cst_26 {dimension_numbers = #tpu.dot_dimension_numbers<[1], [1], [0], [0], [0, 0, 1, 0], [], []>} : vector<8x8xbf16>, vector<8x8xbf16>, vector<8x8xf32> -> vector<8x8xf32>
    %67 = arith.addf %66, %8 : vector<8x8xf32>
    %cst_27 = arith.constant dense<0xFF800000> : vector<8xf32>
    %68 = vector.multi_reduction <maximumf>, %67, %cst_27 [1] : vector<8x8xf32> to vector<8xf32>
    %69 = vector.shape_cast %68 : vector<8xf32> to vector<8x1xf32>
    %70 = vector.broadcast %69 : vector<8x1xf32> to vector<8x8xf32>
    %71 = arith.subf %67, %70 : vector<8x8xf32>
    %72 = math.exp %71 : vector<8x8xf32>
    %cst_28 = arith.constant dense<0.000000e+00> : vector<8xf32>
    %73 = vector.multi_reduction <add>, %72, %cst_28 [1] : vector<8x8xf32> to vector<8xf32>
    %74 = vector.shape_cast %73 : vector<8xf32> to vector<8x1xf32>
    %75 = tpu.reciprocal %74 {approx = true} : vector<8x1xf32> -> vector<8x1xf32>
    %76 = vector.broadcast %75 : vector<8x1xf32> to vector<8x8xf32>
    %77 = arith.mulf %72, %76 : vector<8x8xf32>
    %78 = arith.truncf %77 : vector<8x8xf32> to vector<8x8xbf16>
    %cst_29 = arith.constant dense<0.000000e+00> : vector<8x8xf32>
    %79 = tpu.matmul %78, %65, %cst_29 {dimension_numbers = #tpu.dot_dimension_numbers<[1], [0], [0], [1], [0, 0, 1, 1], [], []>} : vector<8x8xbf16>, vector<8x8xbf16>, vector<8x8xf32> -> vector<8x8xf32>
    %80 = tpu.concatenate %31, %47, %63, %79 in 1 : vector<8x8xf32>, vector<8x8xf32>, vector<8x8xf32>, vector<8x8xf32> -> vector<8x32xf32>
    %81 = arith.truncf %80 : vector<8x32xf32> to vector<8x32xbf16>
    %c0_30 = arith.constant 0 : index
    %c0_31 = arith.constant 0 : index
    %82 = vector.load %arg7[%c0_30, %c0_31] : memref<32x32xbf16, #tpu.memory_space<vmem>>, vector<32x32xbf16>
    %cst_32 = arith.constant dense<0.000000e+00> : vector<8x32xf32>
    %83 = tpu.matmul %81, %82, %cst_32 {dimension_numbers = #tpu.dot_dimension_numbers<[1], [0], [0], [1], [0, 0, 1, 1], [], []>} : vector<8x32xbf16>, vector<32x32xbf16>, vector<8x32xf32> -> vector<8x32xf32>
    %c0_33 = arith.constant 0 : index
    %c0_34 = arith.constant 0 : index
    %84 = vector.load %arg8[%c0_33, %c0_34] : memref<1x32xf32, #tpu.memory_space<vmem>>, vector<1x32xf32>
    %85 = vector.broadcast %84 : vector<1x32xf32> to vector<8x32xf32>
    %86 = arith.addf %83, %85 : vector<8x32xf32>
    %87 = arith.addf %86, %1 : vector<8x32xf32>
    %cst_35 = arith.constant dense<0.000000e+00> : vector<8xf32>
    %88 = vector.multi_reduction <add>, %87, %cst_35 [1] : vector<8x32xf32> to vector<8xf32>
    %89 = vector.shape_cast %88 : vector<8xf32> to vector<8x1xf32>
    %cst_36 = arith.constant 3.200000e+01 : f32
    %90 = vector.broadcast %cst_36 : f32 to vector<8x1xf32>
    %91 = arith.divf %89, %90 : vector<8x1xf32>
    %92 = vector.broadcast %91 : vector<8x1xf32> to vector<8x32xf32>
    %93 = arith.subf %87, %92 : vector<8x32xf32>
    %94 = arith.mulf %93, %93 : vector<8x32xf32>
    %cst_37 = arith.constant dense<0.000000e+00> : vector<8xf32>
    %95 = vector.multi_reduction <add>, %94, %cst_37 [1] : vector<8x32xf32> to vector<8xf32>
    %96 = vector.shape_cast %95 : vector<8xf32> to vector<8x1xf32>
    %cst_38 = arith.constant 3.200000e+01 : f32
    %97 = vector.broadcast %cst_38 : f32 to vector<8x1xf32>
    %98 = arith.divf %96, %97 : vector<8x1xf32>
    %99 = vector.broadcast %91 : vector<8x1xf32> to vector<8x32xf32>
    %100 = arith.subf %87, %99 : vector<8x32xf32>
    %cst_39 = arith.constant 9.99999974E-6 : f32
    %101 = vector.broadcast %cst_39 : f32 to vector<8x1xf32>
    %102 = arith.addf %98, %101 : vector<8x1xf32>
    %103 = math.rsqrt %102 : vector<8x1xf32>
    %104 = vector.broadcast %103 : vector<8x1xf32> to vector<8x32xf32>
    %105 = arith.mulf %100, %104 : vector<8x32xf32>
    %c0_40 = arith.constant 0 : index
    %c0_41 = arith.constant 0 : index
    %106 = vector.load %arg9[%c0_40, %c0_41] : memref<1x32xf32, #tpu.memory_space<vmem>>, vector<1x32xf32>
    %107 = vector.broadcast %106 : vector<1x32xf32> to vector<8x32xf32>
    %108 = arith.mulf %105, %107 : vector<8x32xf32>
    %c0_42 = arith.constant 0 : index
    %c0_43 = arith.constant 0 : index
    %109 = vector.load %arg10[%c0_42, %c0_43] : memref<1x32xf32, #tpu.memory_space<vmem>>, vector<1x32xf32>
    %110 = vector.broadcast %109 : vector<1x32xf32> to vector<8x32xf32>
    %111 = arith.addf %108, %110 : vector<8x32xf32>
    %cst_44 = arith.constant 0.176776692 : f32
    %112 = vector.broadcast %cst_44 : f32 to vector<8x32xf32>
    %113 = arith.mulf %111, %112 : vector<8x32xf32>
    %114 = arith.truncf %113 : vector<8x32xf32> to vector<8x32xbf16>
    %115 = arith.truncf %5 : vector<8x32xf32> to vector<8x32xbf16>
    %116 = vector.extract_strided_slice %114 {offsets = [0, 0], sizes = [8, 8], strides = [1, 1]} : vector<8x32xbf16> to vector<8x8xbf16>
    %117 = vector.extract_strided_slice %115 {offsets = [0, 0], sizes = [8, 8], strides = [1, 1]} : vector<8x32xbf16> to vector<8x8xbf16>
    %cst_45 = arith.constant dense<0.000000e+00> : vector<8x8xf32>
    %118 = tpu.matmul %116, %117, %cst_45 {dimension_numbers = #tpu.dot_dimension_numbers<[1], [1], [0], [0], [0, 0, 1, 0], [], []>} : vector<8x8xbf16>, vector<8x8xbf16>, vector<8x8xf32> -> vector<8x8xf32>
    %119 = arith.addf %118, %11 : vector<8x8xf32>
    %cst_46 = arith.constant dense<0xFF800000> : vector<8xf32>
    %120 = vector.multi_reduction <maximumf>, %119, %cst_46 [1] : vector<8x8xf32> to vector<8xf32>
    %121 = vector.shape_cast %120 : vector<8xf32> to vector<8x1xf32>
    %122 = vector.broadcast %121 : vector<8x1xf32> to vector<8x8xf32>
    %123 = arith.subf %119, %122 : vector<8x8xf32>
    %124 = math.exp %123 : vector<8x8xf32>
    %cst_47 = arith.constant dense<0.000000e+00> : vector<8xf32>
    %125 = vector.multi_reduction <add>, %124, %cst_47 [1] : vector<8x8xf32> to vector<8xf32>
    %126 = vector.shape_cast %125 : vector<8xf32> to vector<8x1xf32>
    %127 = tpu.reciprocal %126 {approx = true} : vector<8x1xf32> -> vector<8x1xf32>
    %128 = vector.broadcast %127 : vector<8x1xf32> to vector<8x8xf32>
    %129 = arith.mulf %124, %128 : vector<8x8xf32>
    %130 = arith.truncf %129 : vector<8x8xf32> to vector<8x8xbf16>
    %cst_48 = arith.constant dense<0.000000e+00> : vector<8x8xf32>
    %131 = tpu.matmul %130, %117, %cst_48 {dimension_numbers = #tpu.dot_dimension_numbers<[1], [0], [0], [1], [0, 0, 1, 1], [], []>} : vector<8x8xbf16>, vector<8x8xbf16>, vector<8x8xf32> -> vector<8x8xf32>
    %132 = vector.extract_strided_slice %114 {offsets = [0, 8], sizes = [8, 8], strides = [1, 1]} : vector<8x32xbf16> to vector<8x8xbf16>
    %133 = vector.extract_strided_slice %115 {offsets = [0, 8], sizes = [8, 8], strides = [1, 1]} : vector<8x32xbf16> to vector<8x8xbf16>
    %cst_49 = arith.constant dense<0.000000e+00> : vector<8x8xf32>
    %134 = tpu.matmul %132, %133, %cst_49 {dimension_numbers = #tpu.dot_dimension_numbers<[1], [1], [0], [0], [0, 0, 1, 0], [], []>} : vector<8x8xbf16>, vector<8x8xbf16>, vector<8x8xf32> -> vector<8x8xf32>
    %135 = arith.addf %134, %11 : vector<8x8xf32>
    %cst_50 = arith.constant dense<0xFF800000> : vector<8xf32>
    %136 = vector.multi_reduction <maximumf>, %135, %cst_50 [1] : vector<8x8xf32> to vector<8xf32>
    %137 = vector.shape_cast %136 : vector<8xf32> to vector<8x1xf32>
    %138 = vector.broadcast %137 : vector<8x1xf32> to vector<8x8xf32>
    %139 = arith.subf %135, %138 : vector<8x8xf32>
    %140 = math.exp %139 : vector<8x8xf32>
    %cst_51 = arith.constant dense<0.000000e+00> : vector<8xf32>
    %141 = vector.multi_reduction <add>, %140, %cst_51 [1] : vector<8x8xf32> to vector<8xf32>
    %142 = vector.shape_cast %141 : vector<8xf32> to vector<8x1xf32>
    %143 = tpu.reciprocal %142 {approx = true} : vector<8x1xf32> -> vector<8x1xf32>
    %144 = vector.broadcast %143 : vector<8x1xf32> to vector<8x8xf32>
    %145 = arith.mulf %140, %144 : vector<8x8xf32>
    %146 = arith.truncf %145 : vector<8x8xf32> to vector<8x8xbf16>
    %cst_52 = arith.constant dense<0.000000e+00> : vector<8x8xf32>
    %147 = tpu.matmul %146, %133, %cst_52 {dimension_numbers = #tpu.dot_dimension_numbers<[1], [0], [0], [1], [0, 0, 1, 1], [], []>} : vector<8x8xbf16>, vector<8x8xbf16>, vector<8x8xf32> -> vector<8x8xf32>
    %148 = vector.extract_strided_slice %114 {offsets = [0, 16], sizes = [8, 8], strides = [1, 1]} : vector<8x32xbf16> to vector<8x8xbf16>
    %149 = vector.extract_strided_slice %115 {offsets = [0, 16], sizes = [8, 8], strides = [1, 1]} : vector<8x32xbf16> to vector<8x8xbf16>
    %cst_53 = arith.constant dense<0.000000e+00> : vector<8x8xf32>
    %150 = tpu.matmul %148, %149, %cst_53 {dimension_numbers = #tpu.dot_dimension_numbers<[1], [1], [0], [0], [0, 0, 1, 0], [], []>} : vector<8x8xbf16>, vector<8x8xbf16>, vector<8x8xf32> -> vector<8x8xf32>
    %151 = arith.addf %150, %11 : vector<8x8xf32>
    %cst_54 = arith.constant dense<0xFF800000> : vector<8xf32>
    %152 = vector.multi_reduction <maximumf>, %151, %cst_54 [1] : vector<8x8xf32> to vector<8xf32>
    %153 = vector.shape_cast %152 : vector<8xf32> to vector<8x1xf32>
    %154 = vector.broadcast %153 : vector<8x1xf32> to vector<8x8xf32>
    %155 = arith.subf %151, %154 : vector<8x8xf32>
    %156 = math.exp %155 : vector<8x8xf32>
    %cst_55 = arith.constant dense<0.000000e+00> : vector<8xf32>
    %157 = vector.multi_reduction <add>, %156, %cst_55 [1] : vector<8x8xf32> to vector<8xf32>
    %158 = vector.shape_cast %157 : vector<8xf32> to vector<8x1xf32>
    %159 = tpu.reciprocal %158 {approx = true} : vector<8x1xf32> -> vector<8x1xf32>
    %160 = vector.broadcast %159 : vector<8x1xf32> to vector<8x8xf32>
    %161 = arith.mulf %156, %160 : vector<8x8xf32>
    %162 = arith.truncf %161 : vector<8x8xf32> to vector<8x8xbf16>
    %cst_56 = arith.constant dense<0.000000e+00> : vector<8x8xf32>
    %163 = tpu.matmul %162, %149, %cst_56 {dimension_numbers = #tpu.dot_dimension_numbers<[1], [0], [0], [1], [0, 0, 1, 1], [], []>} : vector<8x8xbf16>, vector<8x8xbf16>, vector<8x8xf32> -> vector<8x8xf32>
    %164 = vector.extract_strided_slice %114 {offsets = [0, 24], sizes = [8, 8], strides = [1, 1]} : vector<8x32xbf16> to vector<8x8xbf16>
    %165 = vector.extract_strided_slice %115 {offsets = [0, 24], sizes = [8, 8], strides = [1, 1]} : vector<8x32xbf16> to vector<8x8xbf16>
    %cst_57 = arith.constant dense<0.000000e+00> : vector<8x8xf32>
    %166 = tpu.matmul %164, %165, %cst_57 {dimension_numbers = #tpu.dot_dimension_numbers<[1], [1], [0], [0], [0, 0, 1, 0], [], []>} : vector<8x8xbf16>, vector<8x8xbf16>, vector<8x8xf32> -> vector<8x8xf32>
    %167 = arith.addf %166, %11 : vector<8x8xf32>
    %cst_58 = arith.constant dense<0xFF800000> : vector<8xf32>
    %168 = vector.multi_reduction <maximumf>, %167, %cst_58 [1] : vector<8x8xf32> to vector<8xf32>
    %169 = vector.shape_cast %168 : vector<8xf32> to vector<8x1xf32>
    %170 = vector.broadcast %169 : vector<8x1xf32> to vector<8x8xf32>
    %171 = arith.subf %167, %170 : vector<8x8xf32>
    %172 = math.exp %171 : vector<8x8xf32>
    %cst_59 = arith.constant dense<0.000000e+00> : vector<8xf32>
    %173 = vector.multi_reduction <add>, %172, %cst_59 [1] : vector<8x8xf32> to vector<8xf32>
    %174 = vector.shape_cast %173 : vector<8xf32> to vector<8x1xf32>
    %175 = tpu.reciprocal %174 {approx = true} : vector<8x1xf32> -> vector<8x1xf32>
    %176 = vector.broadcast %175 : vector<8x1xf32> to vector<8x8xf32>
    %177 = arith.mulf %172, %176 : vector<8x8xf32>
    %178 = arith.truncf %177 : vector<8x8xf32> to vector<8x8xbf16>
    %cst_60 = arith.constant dense<0.000000e+00> : vector<8x8xf32>
    %179 = tpu.matmul %178, %165, %cst_60 {dimension_numbers = #tpu.dot_dimension_numbers<[1], [0], [0], [1], [0, 0, 1, 1], [], []>} : vector<8x8xbf16>, vector<8x8xbf16>, vector<8x8xf32> -> vector<8x8xf32>
    %180 = tpu.concatenate %131, %147, %163, %179 in 1 : vector<8x8xf32>, vector<8x8xf32>, vector<8x8xf32>, vector<8x8xf32> -> vector<8x32xf32>
    %181 = arith.truncf %180 : vector<8x32xf32> to vector<8x32xbf16>
    %c0_61 = arith.constant 0 : index
    %c0_62 = arith.constant 0 : index
    %182 = vector.load %arg11[%c0_61, %c0_62] : memref<32x32xbf16, #tpu.memory_space<vmem>>, vector<32x32xbf16>
    %cst_63 = arith.constant dense<0.000000e+00> : vector<8x32xf32>
    %183 = tpu.matmul %181, %182, %cst_63 {dimension_numbers = #tpu.dot_dimension_numbers<[1], [0], [0], [1], [0, 0, 1, 1], [], []>} : vector<8x32xbf16>, vector<32x32xbf16>, vector<8x32xf32> -> vector<8x32xf32>
    %c0_64 = arith.constant 0 : index
    %c0_65 = arith.constant 0 : index
    %184 = vector.load %arg12[%c0_64, %c0_65] : memref<1x32xf32, #tpu.memory_space<vmem>>, vector<1x32xf32>
    %185 = vector.broadcast %184 : vector<1x32xf32> to vector<8x32xf32>
    %186 = arith.addf %183, %185 : vector<8x32xf32>
    %187 = arith.addf %186, %111 : vector<8x32xf32>
    %cst_66 = arith.constant dense<0.000000e+00> : vector<8xf32>
    %188 = vector.multi_reduction <add>, %187, %cst_66 [1] : vector<8x32xf32> to vector<8xf32>
    %189 = vector.shape_cast %188 : vector<8xf32> to vector<8x1xf32>
    %cst_67 = arith.constant 3.200000e+01 : f32
    %190 = vector.broadcast %cst_67 : f32 to vector<8x1xf32>
    %191 = arith.divf %189, %190 : vector<8x1xf32>
    %192 = vector.broadcast %191 : vector<8x1xf32> to vector<8x32xf32>
    %193 = arith.subf %187, %192 : vector<8x32xf32>
    %194 = arith.mulf %193, %193 : vector<8x32xf32>
    %cst_68 = arith.constant dense<0.000000e+00> : vector<8xf32>
    %195 = vector.multi_reduction <add>, %194, %cst_68 [1] : vector<8x32xf32> to vector<8xf32>
    %196 = vector.shape_cast %195 : vector<8xf32> to vector<8x1xf32>
    %cst_69 = arith.constant 3.200000e+01 : f32
    %197 = vector.broadcast %cst_69 : f32 to vector<8x1xf32>
    %198 = arith.divf %196, %197 : vector<8x1xf32>
    %199 = vector.broadcast %191 : vector<8x1xf32> to vector<8x32xf32>
    %200 = arith.subf %187, %199 : vector<8x32xf32>
    %cst_70 = arith.constant 9.99999974E-6 : f32
    %201 = vector.broadcast %cst_70 : f32 to vector<8x1xf32>
    %202 = arith.addf %198, %201 : vector<8x1xf32>
    %203 = math.rsqrt %202 : vector<8x1xf32>
    %204 = vector.broadcast %203 : vector<8x1xf32> to vector<8x32xf32>
    %205 = arith.mulf %200, %204 : vector<8x32xf32>
    %c0_71 = arith.constant 0 : index
    %c0_72 = arith.constant 0 : index
    %206 = vector.load %arg13[%c0_71, %c0_72] : memref<1x32xf32, #tpu.memory_space<vmem>>, vector<1x32xf32>
    %207 = vector.broadcast %206 : vector<1x32xf32> to vector<8x32xf32>
    %208 = arith.mulf %205, %207 : vector<8x32xf32>
    %c0_73 = arith.constant 0 : index
    %c0_74 = arith.constant 0 : index
    %209 = vector.load %arg14[%c0_73, %c0_74] : memref<1x32xf32, #tpu.memory_space<vmem>>, vector<1x32xf32>
    %210 = vector.broadcast %209 : vector<1x32xf32> to vector<8x32xf32>
    %211 = arith.addf %208, %210 : vector<8x32xf32>
    %212 = arith.truncf %211 : vector<8x32xf32> to vector<8x32xbf16>
    %c0_75 = arith.constant 0 : index
    %c0_76 = arith.constant 0 : index
    %213 = vector.load %arg15[%c0_75, %c0_76] : memref<32x128xbf16, #tpu.memory_space<vmem>>, vector<32x128xbf16>
    %cst_77 = arith.constant dense<0.000000e+00> : vector<8x128xf32>
    %214 = tpu.matmul %212, %213, %cst_77 {dimension_numbers = #tpu.dot_dimension_numbers<[1], [0], [0], [1], [0, 0, 1, 1], [], []>} : vector<8x32xbf16>, vector<32x128xbf16>, vector<8x128xf32> -> vector<8x128xf32>
    %c0_78 = arith.constant 0 : index
    %c0_79 = arith.constant 0 : index
    %215 = vector.load %arg16[%c0_78, %c0_79] : memref<1x128xf32, #tpu.memory_space<vmem>>, vector<1x128xf32>
    %216 = vector.broadcast %215 : vector<1x128xf32> to vector<8x128xf32>
    %217 = arith.addf %214, %216 : vector<8x128xf32>
    %cst_80 = arith.constant 0.000000e+00 : f32
    %218 = vector.broadcast %cst_80 : f32 to vector<8x128xf32>
    %219 = arith.maximumf %217, %218 : vector<8x128xf32>
    %220 = arith.truncf %219 : vector<8x128xf32> to vector<8x128xbf16>
    %c0_81 = arith.constant 0 : index
    %c0_82 = arith.constant 0 : index
    %221 = vector.load %arg17[%c0_81, %c0_82] : memref<128x32xbf16, #tpu.memory_space<vmem>>, vector<128x32xbf16>
    %cst_83 = arith.constant dense<0.000000e+00> : vector<8x32xf32>
    %222 = tpu.matmul %220, %221, %cst_83 {dimension_numbers = #tpu.dot_dimension_numbers<[1], [0], [0], [1], [0, 0, 1, 1], [], []>} : vector<8x128xbf16>, vector<128x32xbf16>, vector<8x32xf32> -> vector<8x32xf32>
    %c0_84 = arith.constant 0 : index
    %c0_85 = arith.constant 0 : index
    %223 = vector.load %arg18[%c0_84, %c0_85] : memref<1x32xf32, #tpu.memory_space<vmem>>, vector<1x32xf32>
    %224 = vector.broadcast %223 : vector<1x32xf32> to vector<8x32xf32>
    %225 = arith.addf %222, %224 : vector<8x32xf32>
    %226 = arith.addf %225, %211 : vector<8x32xf32>
    %cst_86 = arith.constant dense<0.000000e+00> : vector<8xf32>
    %227 = vector.multi_reduction <add>, %226, %cst_86 [1] : vector<8x32xf32> to vector<8xf32>
    %228 = vector.shape_cast %227 : vector<8xf32> to vector<8x1xf32>
    %cst_87 = arith.constant 3.200000e+01 : f32
    %229 = vector.broadcast %cst_87 : f32 to vector<8x1xf32>
    %230 = arith.divf %228, %229 : vector<8x1xf32>
    %231 = vector.broadcast %230 : vector<8x1xf32> to vector<8x32xf32>
    %232 = arith.subf %226, %231 : vector<8x32xf32>
    %233 = arith.mulf %232, %232 : vector<8x32xf32>
    %cst_88 = arith.constant dense<0.000000e+00> : vector<8xf32>
    %234 = vector.multi_reduction <add>, %233, %cst_88 [1] : vector<8x32xf32> to vector<8xf32>
    %235 = vector.shape_cast %234 : vector<8xf32> to vector<8x1xf32>
    %cst_89 = arith.constant 3.200000e+01 : f32
    %236 = vector.broadcast %cst_89 : f32 to vector<8x1xf32>
    %237 = arith.divf %235, %236 : vector<8x1xf32>
    %238 = vector.broadcast %230 : vector<8x1xf32> to vector<8x32xf32>
    %239 = arith.subf %226, %238 : vector<8x32xf32>
    %cst_90 = arith.constant 9.99999974E-6 : f32
    %240 = vector.broadcast %cst_90 : f32 to vector<8x1xf32>
    %241 = arith.addf %237, %240 : vector<8x1xf32>
    %242 = math.rsqrt %241 : vector<8x1xf32>
    %243 = vector.broadcast %242 : vector<8x1xf32> to vector<8x32xf32>
    %244 = arith.mulf %239, %243 : vector<8x32xf32>
    %c0_91 = arith.constant 0 : index
    %c0_92 = arith.constant 0 : index
    %245 = vector.load %arg19[%c0_91, %c0_92] : memref<1x32xf32, #tpu.memory_space<vmem>>, vector<1x32xf32>
    %246 = vector.broadcast %245 : vector<1x32xf32> to vector<8x32xf32>
    %247 = arith.mulf %244, %246 : vector<8x32xf32>
    %c0_93 = arith.constant 0 : index
    %c0_94 = arith.constant 0 : index
    %248 = vector.load %arg20[%c0_93, %c0_94] : memref<1x32xf32, #tpu.memory_space<vmem>>, vector<1x32xf32>
    %249 = vector.broadcast %248 : vector<1x32xf32> to vector<8x32xf32>
    %250 = arith.addf %247, %249 : vector<8x32xf32>
    %c0_95 = arith.constant 0 : index
    %c0_96 = arith.constant 0 : index
    %c0_97 = arith.constant 0 : index
    %251 = vector.load %arg21[%c0_95, %c0_96, %c0_97] : memref<1x8x32xf32, #tpu.memory_space<vmem>>, vector<1x8x32xf32>
    %252 = vector.shape_cast %251 : vector<1x8x32xf32> to vector<8x32xf32>
    %253 = vector.shape_cast %250 : vector<8x32xf32> to vector<1x8x32xf32>
    tpu.vector_store %arg21[%c0_95, %c0_96, %c0_97], %253 {strides = array<i32>} : memref<1x8x32xf32, #tpu.memory_space<vmem>>, vector<1x8x32xf32>,
    return
  }
  func.func @transform_0(%arg0: i32, %arg1: i32) -> (i32, i32, i32) {
    %c0_i32 = arith.constant 0 : i32
    %c0_i32_0 = arith.constant 0 : i32
    return %arg0, %arg1, %c0_i32 : i32, i32, i32
  }
  func.func @transform_1(%arg0: i32, %arg1: i32) -> (i32, i32, i32) {
    %c0_i32 = arith.constant 0 : i32
    %c0_i32_0 = arith.constant 0 : i32
    %c0_i32_1 = arith.constant 0 : i32
    return %arg0, %c0_i32, %c0_i32_0 : i32, i32, i32
  }
  func.func @transform_2(%arg0: i32, %arg1: i32) -> (i32, i32, i32) {
    %c0_i32 = arith.constant 0 : i32
    %c0_i32_0 = arith.constant 0 : i32
    %c0_i32_1 = arith.constant 0 : i32
    return %arg0, %c0_i32, %c0_i32_0 : i32, i32, i32
  }
  func.func @transform_3(%arg0: i32, %arg1: i32) -> (i32, i32, i32) {
    %c0_i32 = arith.constant 0 : i32
    %c0_i32_0 = arith.constant 0 : i32
    return %arg0, %arg1, %c0_i32 : i32, i32, i32
  }
  func.func @transform_4(%arg0: i32, %arg1: i32) -> (i32, i32, i32) {
    %c0_i32 = arith.constant 0 : i32
    %c0_i32_0 = arith.constant 0 : i32
    return %arg0, %arg1, %c0_i32 : i32, i32, i32
  }
  func.func @transform_5(%arg0: i32, %arg1: i32) -> (i32, i32) {
    %c0_i32 = arith.constant 0 : i32
    %c0_i32_0 = arith.constant 0 : i32
    %c0_i32_1 = arith.constant 0 : i32
    return %c0_i32, %c0_i32_0 : i32, i32
  }
  func.func @transform_6(%arg0: i32, %arg1: i32) -> (i32, i32) {
    %c0_i32 = arith.constant 0 : i32
    %c0_i32_0 = arith.constant 0 : i32
    %c0_i32_1 = arith.constant 0 : i32
    return %c0_i32, %c0_i32_0 : i32, i32
  }
  func.func @transform_7(%arg0: i32, %arg1: i32) -> (i32, i32) {
    %c0_i32 = arith.constant 0 : i32
    %c0_i32_0 = arith.constant 0 : i32
    %c0_i32_1 = arith.constant 0 : i32
    return %c0_i32, %c0_i32_0 : i32, i32
  }
  func.func @transform_8(%arg0: i32, %arg1: i32) -> (i32, i32) {
    %c0_i32 = arith.constant 0 : i32
    %c0_i32_0 = arith.constant 0 : i32
    %c0_i32_1 = arith.constant 0 : i32
    return %c0_i32, %c0_i32_0 : i32, i32
  }
  func.func @transform_9(%arg0: i32, %arg1: i32) -> (i32, i32) {
    %c0_i32 = arith.constant 0 : i32
    %c0_i32_0 = arith.constant 0 : i32
    %c0_i32_1 = arith.constant 0 : i32
    return %c0_i32, %c0_i32_0 : i32, i32
  }
  func.func @transform_10(%arg0: i32, %arg1: i32) -> (i32, i32) {
    %c0_i32 = arith.constant 0 : i32
    %c0_i32_0 = arith.constant 0 : i32
    %c0_i32_1 = arith.constant 0 : i32
    return %c0_i32, %c0_i32_0 : i32, i32
  }
  func.func @transform_11(%arg0: i32, %arg1: i32) -> (i32, i32) {
    %c0_i32 = arith.constant 0 : i32
    %c0_i32_0 = arith.constant 0 : i32
    %c0_i32_1 = arith.constant 0 : i32
    return %c0_i32, %c0_i32_0 : i32, i32
  }
  func.func @transform_12(%arg0: i32, %arg1: i32) -> (i32, i32) {
    %c0_i32 = arith.constant 0 : i32
    %c0_i32_0 = arith.constant 0 : i32
    %c0_i32_1 = arith.constant 0 : i32
    return %c0_i32, %c0_i32_0 : i32, i32
  }
  func.func @transform_13(%arg0: i32, %arg1: i32) -> (i32, i32) {
    %c0_i32 = arith.constant 0 : i32
    %c0_i32_0 = arith.constant 0 : i32
    %c0_i32_1 = arith.constant 0 : i32
    return %c0_i32, %c0_i32_0 : i32, i32
  }
  func.func @transform_14(%arg0: i32, %arg1: i32) -> (i32, i32) {
    %c0_i32 = arith.constant 0 : i32
    %c0_i32_0 = arith.constant 0 : i32
    %c0_i32_1 = arith.constant 0 : i32
    return %c0_i32, %c0_i32_0 : i32, i32
  }
  func.func @transform_15(%arg0: i32, %arg1: i32) -> (i32, i32) {
    %c0_i32 = arith.constant 0 : i32
    %c0_i32_0 = arith.constant 0 : i32
    %c0_i32_1 = arith.constant 0 : i32
    return %c0_i32, %c0_i32_0 : i32, i32
  }
  func.func @transform_16(%arg0: i32, %arg1: i32) -> (i32, i32) {
    %c0_i32 = arith.constant 0 : i32
    %c0_i32_0 = arith.constant 0 : i32
    %c0_i32_1 = arith.constant 0 : i32
    return %c0_i32, %c0_i32_0 : i32, i32
  }
  func.func @transform_17(%arg0: i32, %arg1: i32) -> (i32, i32) {
    %c0_i32 = arith.constant 0 : i32
    %c0_i32_0 = arith.constant 0 : i32
    %c0_i32_1 = arith.constant 0 : i32
    return %c0_i32, %c0_i32_0 : i32, i32
  }
  func.func @transform_18(%arg0: i32, %arg1: i32) -> (i32, i32) {
    %c0_i32 = arith.constant 0 : i32
    %c0_i32_0 = arith.constant 0 : i32
    %c0_i32_1 = arith.constant 0 : i32
    return %c0_i32, %c0_i32_0 : i32, i32
  }
  func.func @transform_19(%arg0: i32, %arg1: i32) -> (i32, i32, i32) {
    %c0_i32 = arith.constant 0 : i32
    %c0_i32_0 = arith.constant 0 : i32
    return %arg0, %arg1, %c0_i32 : i32, i32, i32
  }
}

</mosaic_0001>

<bundles_post_ra>
// kernel: decoder_forward.5
= control target key start
LH: loop header
LB: loop body
LE: loop exit
PB: predicated region body
PF: predicated region fallthrough
CT: control target
= control target key end

     0   :  { %s448_s12 = smov 0   ;;  %s450_s13 = smov 0   ;;  %s487_s0 = inlined_call_operand.vmem [shape: f32[16,32], index: 0, kind: input, shape index: {}]   ;;  %s488_s1 = inlined_call_operand.vmem [shape: bf16[32,128], index: 1, kind: input, shape index: {}]   ;;  %s489_s2 = inlined_call_operand.vmem [shape: f32[1,128], index: 2, kind: input, shape index: {}]   ;;  %s490_s3 = inlined_call_operand.vmem [shape: f32[16,128], index: 3, kind: output, shape index: {}]  }
   0x1   :  { %s452_s14 = smov 0  }
   0x2 LB: > { %s25_s15 = sadd.s32 1, %s422_s13  ;;  %p363_p0 = scmp.ge.s32.totalorder %s426_s14, 1  ;;  %s426_s14 = sphi %s452_s14, %s13_s14   ;;  %s422_s13 = sphi %s450_s13, %s492_s13   ;;  %s418_s12 = sphi %s448_s12, %s491_s12  }
   0x3   : > { %p27_p1 = scmp.ge.s32.totalorder %s25_s15, 2  ;;  %p167_p2 = scmp.lt.s32.totalorder %s426_s14, 3 }
   0x5   : > { %s494_s15 = smov (%p27_p1, %s25_s15), 0  ;;  %p168_p3 = pnand %p363_p0, %p167_p2 }
   0x6   : > { %p199_p4 = scmp.lt.s32.totalorder (!%p168_p3), %s418_s12, 1 }
   0x7   : > { %171 = sbr.rel (%p168_p3) target bundleno = 154 (0x9a), region = 32 }
   0xc   : > { %v378_v0 = vld [vmem:[%s488_s1 + $0x8] sm:$0xff]  ;;  %v377_v1 = vld [vmem:[%s488_s1] sm:$0xff]  ;;  %s496_s12 = smov (!%p199_p4, %s418_s12), 1  ;;  %vm240_vm0 = vcmask 261120  }
   0xd   : > { %250 = vmatpush.bf16.msra.mxu0 %v378_v0  ;;  %s364_s20 = sshll.u32 %s496_s12, 3  ;;  %v403_v4 = vld [vmem:[%s489_s2] ss:$0 sm:$0xff] }
   0xe   : > { %s202_s23 = scalar_lea.vmem %s487_s0, %s364_s20  ;;  %s216_s28 = scalar_lea.vmem %s490_s3, %s364_s20 }
   0xf   : > { %v218_v2 = vld [vmem:[%s202_s23] sm:$0xff] }
  0x10   : > { %v219_v3 = vpack.c.bf16 %v218_v2, %v218_v2 }
  0x11   : > { %251 = vmatpush.bf16.msra.mxu0 %v377_v1 }
  0x14   : > { %374 = vmatmul.msk.bf16.vlgmr.msra.gmra.mxu0 %vm240_vm0, %v219_v3 }
  0x91   : > { %v253_v5 = vpop.f32.mrf.mxu0 }
  0x92   : > { %v254_v6 = vadd.f32 %v403_v4, %v253_v5 }
  0x94   : > { %257 = vst [vmem:[%s216_s28] sm:$0xff] %v254_v6 }
  0x99   : > { %v255_v7 = vpop.f32.mrf.mxu0 }
  0x9a PF: > { %s13_s14 = sadd.s32 1, %s426_s14   ;;  %s491_s12 = smov %s422_s13 }
  0x9b   : > { %p10_p5 = scmp.ge.s32.totalorder %s13_s14, 4   ;;  %s492_s13 = smov %s494_s15 }
  0x9d   :  { %12 = sbr.rel (!%p10_p5) target bundleno = 2 (0x2), region = 68 }

// kernel: decoder_forward.3
= control target key start
LH: loop header
LB: loop body
LE: loop exit
PB: predicated region body
PF: predicated region fallthrough
CT: control target
= control target key end

     0   :  { %s1941_s30 = smov 0   ;;  %s1943_s20 = smov 0   ;;  %s2171_s0 = inlined_call_operand.vmem [shape: f32[2,8,32], index: 0, kind: input, shape index: {}, may-alias: {0,1}]   ;;  %s2172_s1 = inlined_call_operand.vmem [shape: f32[2,8,32], index: 1, kind: input, shape index: {}, may-alias: {0,1}]   ;;  %s2173_s2 = inlined_call_operand.vmem [shape: f32[2,8,32], index: 2, kind: input, shape index: {}]   ;;  %s2174_s3 = inlined_call_operand.vmem [shape: bf16[2,8,8], index: 3, kind: input, shape index: {}]   ;;  %s2175_s4 = inlined_call_operand.vmem [shape: bf16[2,8,8], index: 4, kind: input, shape index: {}]   ;;  %s2176_s5 = inlined_call_operand.vmem [shape: bf16[32,32], index: 5, kind: input, shape index: {}]   ;;  %s2177_s6 = inlined_call_operand.vmem [shape: f32[1,32], index: 6, kind: input, shape index: {}]   ;;  %s2178_s7 = inlined_call_operand.vmem [shape: f32[1,32], index: 7, kind: input, shape index: {}]   ;;  %s2179_s8 = inlined_call_operand.vmem [shape: f32[1,32], index: 8, kind: input, shape index: {}]   ;;  %s2180_s9 = inlined_call_operand.vmem [shape: bf16[32,32], index: 9, kind: input, shape index: {}]   ;;  %s2181_s10 = inlined_call_operand.vmem [shape: f32[1,32], index: 10, kind: input, shape index: {}]   ;;  %s2182_s11 = inlined_call_operand.vmem [shape: f32[1,32], index: 11, kind: input, shape index: {}]   ;;  %s2183_s12 = inlined_call_operand.vmem [shape: f32[1,32], index: 12, kind: input, shape index: {}]   ;;  %s2184_s13 = inlined_call_operand.vmem [shape: bf16[32,128], index: 13, kind: input, shape index: {}]   ;;  %s2185_s14 = inlined_call_operand.vmem [shape: f32[1,128], index: 14, kind: input, shape index: {}]   ;;  %s2186_s15 = inlined_call_operand.vmem [shape: bf16[128,32], index: 15, kind: input, shape index: {}]   ;;  %s2187_s16 = inlined_call_operand.vmem [shape: f32[1,32], index: 16, kind: input, shape index: {}]   ;;  %s2188_s17 = inlined_call_operand.vmem [shape: f32[1,32], index: 17, kind: input, shape index: {}]   ;;  %s2189_s18 = inlined_call_operand.vmem [shape: f32[1,32], index: 18, kind: input, shape index: {}]   ;;  %s2190_s19 = inlined_call_operand.vmem [shape: f32[2,8,32], index: 19, kind: output, shape index: {}]  }
   0x1   :  { %2192 = sst [smem:[#allocation2_spill]] %s2171_s0  ;;  %s1939_s0 = smov 0  }
   0x2   :  { %2193 = sst [smem:[#allocation3_spill]] %s2172_s1 }
   0x3   :  { %2194 = sst [smem:[#allocation4_spill]] %s2173_s2 }
   0x4   :  { %2195 = sst [smem:[#allocation5_spill]] %s2174_s3 }
   0x5 LB: > { %s41_s21 = sadd.s32 1, %s1826_s30  ;;  %p1629_p0 = scmp.ge.s32.totalorder %s1830_s20, 1  ;;  %s1830_s20 = sphi %s1943_s20, %s29_s20   ;;  %s1826_s30 = sphi %s1941_s30, %s2202_s30   ;;  %s1822_s0 = sphi %s1939_s0, %s2201_s0  }
   0x6   : > { %p43_p1 = scmp.ge.s32.totalorder %s41_s21, 2  ;;  %p601_p2 = scmp.lt.s32.totalorder %s1830_s20, 3 }
   0x8   : > { %s2204_s21 = smov (%p43_p1, %s41_s21), 0  ;;  %p602_p3 = pnand %p1629_p0, %p601_p2 }
   0x9   : > { %p683_p4 = scmp.lt.s32.totalorder (!%p602_p3), %s1822_s0, 1  ;;  %s2196_s23 = sld [smem:[#allocation3_spill]] (!%p602_p3) }
   0xa   : > { %605 = sbr.rel (%p602_p3) target bundleno = 3195 (0xc7b), region = 96  ;;  %s2197_s26 = sld [smem:[#allocation2_spill]] (!%p602_p3) }
   0xb   : > { %s1832_s28 = smov (!%p602_p3), 120   ;;  %s1833_s29 = smov (!%p602_p3), 112  }
   0xc   : > { %s1834_s2 = smov (!%p602_p3), 104   ;;  %s2198_s25 = sld [smem:[#allocation5_spill]] (!%p602_p3) }
   0xf   : > { %s2206_s0 = smov (!%p683_p4, %s1822_s0), 1  ;;  %vm730_vm0 = vcmask 64512   ;;  %vm765_vm1 = vcmask 1043456   ;;  %vm959_vm2 = vcmask 130048   ;;  %vm961_vm3 = vcmask 195584  }
  0x10   : > { %s1960_s1 = sshll.u32 %s2206_s0, 3  ;;  %s2191_s22 = sshll.u32 %s2206_s0, 2  ;;  %vm984_vm4 = vcmask 261120  }
  0x11   : > { %s693_s24 = scalar_lea.vmem %s2196_s23, %s1960_s1  ;;  %s689_s27 = scalar_lea.vmem %s2197_s26, %s1960_s1 }
  0x12   : > { %v721_v0 = vld [vmem:[%s693_s24] sm:$0xff]  ;;  %s704_s3 = scalar_lea.vmem %s2198_s25, %s2191_s22  ;;  %s1835_s26 = smov 24  }
  0x13   : > { %v729_v1 = vpack.c.bf16 %v721_v0, %v721_v0  ;;  %v1970_v2 = vld [vmem:[%s689_s27] sm:$0xff]  ;;  %s1836_s27 = smov 8   ;;  %s1837_s23 = smov 16  }
  0x14   : > { %v727_v4 = vmul.f32 0.17677669, %v1970_v2  ;;  %v723_v10 = vld [vmem:[%s704_s3] sm:$0xf]  ;;  %s2199_s24 = sld [smem:[#allocation4_spill]] }
  0x15   : > { %v735_v3 = vsel %vm730_vm0, %v729_v1, 0  ;;  %v787_v6 = vunpack.c.l.b16 %v729_v1  ;;  %v724_v11 = vunpack.c.l.bf16 %v723_v10  ;;  %v766_v27 = vsel %vm765_vm1, %v729_v1, 0 }
  0x16   : > { %744 = vmatpush.bf16.xpose.msra.mxu0 %v735_v3  ;;  %v728_v5 = vpack.c.bf16 %v727_v4, %v727_v4  ;;  %775 = vmatpush.bf16.msra.mxu1 %v766_v27 }
  0x17   : > { %v788_v7 = vpack.c.b16 %v787_v6, %v787_v6 }
  0x18   : > { %v782_v8 = vunpack.c.l.b16 %v728_v5 }
  0x19   : > { %789 = vrot.lane.b32.xlu1 %v788_v7, %s1832_s28  ;;  %842 = vrot.lane.b32.xlu2 %v788_v7, %s1833_s29 }
  0x1a   : > { %v783_v9 = vpack.c.b16 %v782_v8, %v782_v8  ;;  %s697_s22 = scalar_lea.vmem %s2199_s24, %s1960_s1 }
  0x1d   : > { %1636 = vmatmul.msk.bf16.vlgmr.msra.gmra.mxu0 %vm730_vm0, %v728_v5 }
  0x21   : > { %784 = vrot.lane.b32.xlu1 %v783_v9, %s1832_s28  ;;  %895 = vrot.lane.b32.xlu2 %v788_v7, %s1834_s2 }
  0x29   : > { %893 = vrot.lane.b32.xlu1 %v783_v9, %s1834_s2 }
  0x73   : > { %v843_v16 = vpop.permute.xlu2 %842 }
  0x74   : > { %v878_v30 = vsel %vm765_vm1, %v843_v16, 0  ;;  %v848_v35 = vsel %vm730_vm0, %v843_v16, 0 }
  0x7b   : > { %v896_v18 = vpop.permute.xlu2 %895 }
  0x7c   : > { %v901_v20 = vsel %vm730_vm0, %v896_v18, 0  ;;  %v931_v31 = vsel %vm765_vm1, %v896_v18, 0 }
  0x7d   : > { %910 = vmatpush.bf16.xpose.msrb.mxu0 %v901_v20  ;;  %940 = vmatpush.bf16.msra.mxu2 %v931_v31  ;;  %v1758_v31 = vld [vmem:[%s2177_s6] ss:$0 sm:$0xff] }
  0x8b   : > { %v790_v17 = vpop.permute.xlu1 %789 }
  0x8c   : > { %v795_v28 = vsel %vm730_vm0, %v790_v17, 0  ;;  %v825_v29 = vsel %vm765_vm1, %v790_v17, 0 }
  0x8d   : > { %804 = vmatpush.bf16.xpose.msrb.mxu1 %v795_v28  ;;  %834 = vmatpush.bf16.msra.mxu3 %v825_v29 }
  0x91   : > { %887 = vmatpush.bf16.msrb.mxu3 %v878_v30 }
  0x93   : > { %v785_v19 = vpop.permute.xlu1 %784 }
  0x9a   : > { %v746_v12 = vpop.f32.mrf.mxu0 }
  0x9b   : > { %v747_v13 = vadd.f32 %v746_v12, %v724_v11  ;;  %v894_v21 = vpop.permute.xlu1 %893 }
  0x9c   : > { %1642 = vmatmul.msk.bf16.vlgmr.msrb.gmra.mxu0 %vm730_vm0, %v894_v21 }
  0x9d   : > { %v750_v14 = vsel %vm730_vm0, %v747_v13, -inf }
  0x9e   : > { %751 = vmax.xlane.f32.xlu0 %v750_v14 }
  0xa2   : > { %v748_v15 = vpop.f32.mrf.mxu0 }
 0x111   : > { %v752_v22 = vpop.xlane.xlu0 %751 }
 0x112   : > { %v753_v23 = vsub.f32 %v747_v13, %v752_v22  ;;  %v1714_v22 = vld [vmem:[%s2176_s5 + $0x8] sm:$0xff] }
 0x114   : > { %v754_v24 = vmul.f32 1.442695, %v753_v23  ;;  %v1713_v23 = vld [vmem:[%s2176_s5] sm:$0xff] }
 0x116   : > { %1768 = vpow2.f32 %v754_v24 }
 0x119   : > { %v912_v37 = vpop.f32.mrf.mxu0 }
 0x11a   : > { %v913_v38 = vadd.f32 %v912_v37, %v724_v11  ;;  %v1838_v37 = vmov 32.0  }
 0x11c   : > { %v1769_v25 = vpop.eup %1768  ;;  %v916_v39 = vsel %vm730_vm0, %v913_v38, -inf }
 0x11d   : > { %v756_v26 = vsel %vm730_vm0, %v1769_v25, 0.0 }
 0x11e   : > { %757 = vadd.xlane.f32.xlu0 %v756_v26 }
 0x121   : > { %v914_v40 = vpop.f32.mrf.mxu0 }
 0x132   : > { %840 = vrot.lane.b32.xlu0 %v783_v9, %s1833_s29 }
 0x15c   : > { %917 = vmax.xlane.f32.xlu0 %v916_v39 }
 0x191   : > { %v758_v32 = vpop.xlane.xlu0 %757 }
 0x192   : > { %1770 = vrcp.f32 %v758_v32 }
 0x198   : > { %v1771_v33 = vpop.eup %1770 }
 0x199   : > { %v760_v34 = vmul.f32 %v1771_v33, %v1769_v25 }
 0x19b   : > { %v761_v36 = vpack.c.bf16 %v760_v34, %v760_v34 }
 0x19d   : > { %1637 = vmatmul.msk.bf16.vlgmr.msra.gmra.mxu1 %vm730_vm0, %v761_v36 }
 0x19e   : > { %857 = vmatpush.bf16.xpose.msra.mxu1 %v848_v35 }
 0x1a4   : > { %v841_v41 = vpop.permute.xlu0 %840 }
 0x1ad   : > { %1638 = vmatmul.msk.bf16.vlgmr.msrb.gmra.mxu1 %vm730_vm0, %v785_v19 }
 0x1ae   : > { %994 = vmatpush.bf16.msrb.mxu1 %v1714_v22 }
 0x1b2   : > { %995 = vmatpush.bf16.msrb.mxu1 %v1713_v23 }
 0x1bd   : > { %1640 = vmatmul.msk.bf16.vlgmr.msra.gmra.mxu1 %vm730_vm0, %v841_v41 }
 0x1cf   : > { %v918_v47 = vpop.xlane.xlu0 %917 }
 0x1d0   : > { %v919_v49 = vsub.f32 %v913_v38, %v918_v47 }
 0x1d2   : > { %v920_v50 = vmul.f32 1.442695, %v919_v49 }
 0x1d4   : > { %1772 = vpow2.f32 %v920_v50 }
 0x1da   : > { %v1773_v54 = vpop.eup %1772 }
 0x1db   : > { %v922_v56 = vsel %vm730_vm0, %v1773_v54, 0.0 }
 0x21a   : > { %v2001_v42 = vpop.f32.mrf.mxu1 }
 0x222   : > { %v779_v43 = vpop.f32.mrf.mxu1 }
 0x22a   : > { %v806_v44 = vpop.f32.mrf.mxu1 }
 0x22b   : > { %v807_v45 = vadd.f32 %v806_v44, %v724_v11 }
 0x22d   : > { %v810_v46 = vsel %vm730_vm0, %v807_v45, -inf }
 0x22e   : > { %811 = vmax.xlane.f32.xlu2 %v810_v46 }
 0x232   : > { %v808_v48 = vpop.f32.mrf.mxu1 }
 0x233   : > { %v722_v48 = vld [vmem:[%s697_s22] sm:$0xff] }
 0x234   : > { %v1043_v49 = vpack.c.bf16 %v722_v48, %v722_v48 }
 0x236   : > { %v1099_v50 = vunpack.c.l.b16 %v1043_v49 }
 0x23a   : > { %v859_v51 = vpop.f32.mrf.mxu1 }
 0x23b   : > { %v860_v52 = vadd.f32 %v859_v51, %v724_v11  ;;  %v1100_v51 = vpack.c.b16 %v1099_v50, %v1099_v50 }
 0x23d   : > { %v863_v53 = vsel %vm730_vm0, %v860_v52, -inf }
 0x23e   : > { %864 = vmax.xlane.f32.xlu1 %v863_v53 }
 0x242   : > { %v861_v55 = vpop.f32.mrf.mxu1 }
 0x246   : > { %923 = vadd.xlane.f32.xlu1 %v922_v56 }
 0x2a1   : > { %v812_v57 = vpop.xlane.xlu2 %811 }
 0x2a2   : > { %v813_v58 = vsub.f32 %v807_v45, %v812_v57 }
 0x2a4   : > { %v814_v59 = vmul.f32 1.442695, %v813_v58 }
 0x2a6   : > { %1774 = vpow2.f32 %v814_v59 }
 0x2ac   : > { %v1775_v60 = vpop.eup %1774 }
 0x2ad   : > { %v816_v61 = vsel %vm730_vm0, %v1775_v60, 0.0 }
 0x2ae   : > { %817 = vadd.xlane.f32.xlu2 %v816_v61 }
 0x2b1   : > { %v865_v62 = vpop.xlane.xlu1 %864 }
 0x2b2   : > { %v866_v63 = vsub.f32 %v860_v52, %v865_v62  ;;  %v1048_v52 = vsel %vm730_vm0, %v1043_v49, 0  ;;  %v1759_v62 = vld [vmem:[%s2178_s7] ss:$0 sm:$0xff] }
 0x2b4   : > { %v867_v0 = vmul.f32 1.442695, %v866_v63 }
 0x2b6   : > { %1776 = vpow2.f32 %v867_v0  ;;  %v1760_v0 = vld [vmem:[%s2179_s8] ss:$0 sm:$0xff] }
 0x2b9   : > { %v924_v1 = vpop.xlane.xlu1 %923 }
 0x2ba   : > { %1778 = vrcp.f32 %v924_v1 }
 0x2bc   : > { %v1777_v3 = vpop.eup %1776 }
 0x2bd   : > { %v869_v4 = vsel %vm730_vm0, %v1777_v3, 0.0 }
 0x2be   : > { %870 = vadd.xlane.f32.xlu2 %v869_v4 }
 0x2c0   : > { %v1779_v5 = vpop.eup %1778 }
 0x2c1   : > { %v926_v6 = vmul.f32 %v1779_v5, %v1773_v54 }
 0x2c3   : > { %v927_v7 = vpack.c.bf16 %v926_v6, %v926_v6 }
 0x2c5   : > { %1643 = vmatmul.msk.bf16.vlgmr.msra.gmra.mxu2 %vm730_vm0, %v927_v7 }
 0x321   : > { %v818_v8 = vpop.xlane.xlu2 %817 }
 0x322   : > { %1780 = vrcp.f32 %v818_v8 }
 0x328   : > { %v1781_v9 = vpop.eup %1780 }
 0x329   : > { %v820_v10 = vmul.f32 %v1781_v9, %v1775_v60  ;;  %v1078_v9 = vsel %vm765_vm1, %v1043_v49, 0 }
 0x32a   : > { %1087 = vmatpush.bf16.msra.mxu0 %v1078_v9 }
 0x32b   : > { %v821_v11 = vpack.c.bf16 %v820_v10, %v820_v10 }
 0x32d   : > { %1639 = vmatmul.msk.bf16.vlgmr.msra.gmra.mxu3 %vm730_vm0, %v821_v11 }
 0x32e   : > { %1057 = vmatpush.bf16.xpose.msra.mxu3 %v1048_v52 }
 0x331   : > { %v871_v12 = vpop.xlane.xlu2 %870 }
 0x332   : > { %1782 = vrcp.f32 %v871_v12 }
 0x333   : > { %1784 = vrcp.f32 %v1838_v37 }
 0x338   : > { %v1783_v13 = vpop.eup %1782 }
 0x339   : > { %v873_v14 = vmul.f32 %v1783_v13, %v1777_v3  ;;  %v1785_v38 = vpop.eup %1784 }
 0x33a   : > { %v1006_v39 = vmul.f32 32.0, %v1785_v38  ;;  %vm1010_vm5 = vweird.f32 %v1785_v38 }
 0x33b   : > { %v874_v15 = vpack.c.bf16 %v873_v14, %v873_v14 }
 0x33c   : > { %v1007_v40 = vsub.f32 1.0, %v1006_v39 }
 0x33d   : > { %1641 = vmatmul.msk.bf16.vlgmr.msrb.gmra.mxu3 %vm730_vm0, %v874_v15 }
 0x33e   : > { %v1008_v41 = vmul.f32 %v1785_v38, %v1007_v40 }
 0x348   : > { %v942_v16 = vpop.f32.mrf.mxu2 }
 0x349   : > { %955 = vrot.lane.b32.xlu0 %v942_v16, %s1835_s26 }
 0x350   : > { %v944_v17 = vpop.f32.mrf.mxu2 }
 0x3b0   : > { %v836_v18 = vpop.f32.mrf.mxu3 }
 0x3b1   : > { %947 = vrot.lane.b32.xlu2 %v836_v18, %s1836_s27 }
 0x3b8   : > { %v838_v19 = vpop.f32.mrf.mxu3 }
 0x3bb   : > { %v956_v27 = vpop.permute.xlu0 %955 }
 0x3c0   : > { %v889_v20 = vpop.f32.mrf.mxu3 }
 0x3c1   : > { %951 = vrot.lane.b32.xlu1 %v889_v20, %s1837_s23 }
 0x3c8   : > { %v891_v21 = vpop.f32.mrf.mxu3 }
 0x3c9   : > { %1101 = vrot.lane.b32.xlu1 %v1100_v51, %s1832_s28 }
 0x3d1   : > { %1154 = vrot.lane.b32.xlu1 %v1100_v51, %s1833_s29 }
 0x40b   : > { %v948_v24 = vpop.permute.xlu2 %947 }
 0x40c   : > { %v958_v25 = vsel %vm730_vm0, %v2001_v42, %v948_v24  ;;  %v1009_v42 = vadd.f32 %v1785_v38, %v1008_v41 }
 0x40e   : > { %v2030_v43 = vsel %vm1010_vm5, %v1785_v38, %v1009_v42 }
 0x433   : > { %v952_v26 = vpop.permute.xlu1 %951 }
 0x434   : > { %v960_v28 = vsel %vm959_vm2, %v958_v25, %v952_v26 }
 0x435   : > { %v962_v29 = vsel %vm961_vm3, %v960_v28, %v956_v27 }
 0x436   : > { %v963_v30 = vpack.c.bf16 %v962_v29, %v962_v29 }
 0x438   : > { %1652 = vmatmul.msk.bf16.vlgmr.msrb.gmra.mxu1 %vm984_vm4, %v963_v30 }
 0x43b   : > { %v1102_v10 = vpop.permute.xlu1 %1101 }
 0x43c   : > { %v1137_v11 = vsel %vm765_vm1, %v1102_v10, 0  ;;  %v1107_v12 = vsel %vm730_vm0, %v1102_v10, 0 }
 0x43d   : > { %1116 = vmatpush.bf16.xpose.msrb.mxu2 %v1107_v12  ;;  %1146 = vmatpush.bf16.msra.mxu1 %v1137_v11 }
 0x443   : > { %v1155_v13 = vpop.permute.xlu1 %1154 }
 0x444   : > { %v1160_v14 = vsel %vm730_vm0, %v1155_v13, 0  ;;  %v1190_v15 = vsel %vm765_vm1, %v1155_v13, 0 }
 0x445   : > { %1169 = vmatpush.bf16.xpose.msrb.mxu3 %v1160_v14  ;;  %1199 = vmatpush.bf16.msrb.mxu0 %v1190_v15 }
 0x4b5   : > { %v997_v32 = vpop.f32.mrf.mxu1 }
 0x4b6   : > { %v998_v33 = vadd.f32 %v1758_v31, %v997_v32 }
 0x4b8   : > { %v1001_v34 = vadd.f32 %v998_v33, %v1970_v2 }
 0x4ba   : > { %v1002_v35 = vsel %vm984_vm4, %v1001_v34, 0.0 }
 0x4bb   : > { %1003 = vadd.xlane.f32.xlu2 %v1002_v35 }
 0x4bd   : > { %v999_v36 = vpop.f32.mrf.mxu1 }
 0x52e   : > { %v1004_v44 = vpop.xlane.xlu2 %1003 }
 0x52f   : > { %v1012_v45 = vmul.f32 %v2030_v43, %v1004_v44 }
 0x531   : > { %v1013_v46 = vsub.f32 %v1001_v34, %v1012_v45 }
 0x533   : > { %v1014_v2 = vmul.f32 %v1013_v46, %v1013_v46 }
 0x535   : > { %v1015_v47 = vsel %vm984_vm4, %v1014_v2, 0.0 }
 0x536   : > { %1016 = vadd.xlane.f32.xlu0 %v1015_v47 }
 0x5a9   : > { %v1017_v53 = vpop.xlane.xlu0 %1016 }
 0x5aa   : > { %v1018_v54 = vmul.f32 %v1017_v53, %v2030_v43 }
 0x5ac   : > { %v1019_v55 = vadd.f32 1e-05, %v1018_v54 }
 0x5ae   : > { %1786 = vrsqrt.f32 %v1019_v55  ;;  %vm1026_vm7 = vweird.f32 %v1019_v55 }
 0x5b4   : > { %v1787_v56 = vpop.eup %1786 }
 0x5b5   : > { %v1021_v57 = vmul.f32 %v1787_v56, %v1019_v55  ;;  %vm1027_vm6 = vweird.f32 %v1787_v56 }
 0x5b6   : > { %vm1028_vm8 = vmor %vm1026_vm7, %vm1027_vm6 }
 0x5b7   : > { %v1022_v58 = vmul.f32 %v1787_v56, %v1021_v57 }
 0x5b9   : > { %v1023_v59 = vmul.f32 0.5, %v1022_v58 }
 0x5bb   : > { %v1024_v60 = vsub.f32 1.5, %v1023_v59 }
 0x5bd   : > { %v1025_v61 = vmul.f32 %v1787_v56, %v1024_v60 }
 0x5bf   : > { %v1029_v63 = vsel %vm1028_vm8, %v1787_v56, %v1025_v61 }
 0x5c0   : > { %v1030_v1 = vmul.f32 %v1029_v63, %v1013_v46 }
 0x5c2   : > { %v1035_v3 = vmul.f32 %v1759_v62, %v1030_v1 }
 0x5c4   : > { %v2048_v4 = vadd.f32 %v1760_v0, %v1035_v3 }
 0x5c6   : > { %v1041_v5 = vmul.f32 0.17677669, %v2048_v4 }
 0x5c8   : > { %v1042_v6 = vpack.c.bf16 %v1041_v5, %v1041_v5 }
 0x5ca   : > { %1653 = vmatmul.msk.bf16.vlgmr.msra.gmra.mxu3 %vm730_vm0, %v1042_v6  ;;  %v1094_v7 = vunpack.c.l.b16 %v1042_v6 }
 0x5cc   : > { %v1095_v8 = vpack.c.b16 %v1094_v7, %v1094_v7 }
 0x5ce   : > { %1205 = vrot.lane.b32.xlu2 %v1095_v8, %s1834_s2  ;;  %1096 = vrot.lane.b32.xlu1 %v1095_v8, %s1832_s28  ;;  %s2200_s28 = sshll.u32 %s2206_s0, 2 }
 0x5cf   : > { %s711_s25 = scalar_lea.vmem %s2175_s4, %s2200_s28  ;;  %s718_s28 = scalar_lea.vmem %s2190_s19, %s1960_s1 }
 0x5d0   : > { %v725_v17 = vld [vmem:[%s711_s25] sm:$0xf] }
 0x5d1   : > { %v726_v21 = vunpack.c.l.bf16 %v725_v17 }
 0x5d6   : > { %1207 = vrot.lane.b32.xlu1 %v1100_v51, %s1834_s2 }
 0x5de   : > { %1152 = vrot.lane.b32.xlu1 %v1095_v8, %s1833_s29 }
 0x628   : > { %v1206_v26 = vpop.permute.xlu2 %1205 }
 0x640   : > { %v1097_v16 = vpop.permute.xlu1 %1096 }
 0x641   : > { %1655 = vmatmul.msk.bf16.vlgmr.msrb.gmra.mxu2 %vm730_vm0, %v1097_v16 }
 0x648   : > { %v1208_v18 = vpop.permute.xlu1 %1207 }
 0x649   : > { %v1213_v19 = vsel %vm730_vm0, %v1208_v18, 0  ;;  %v1243_v20 = vsel %vm765_vm1, %v1208_v18, 0 }
 0x64a   : > { %1222 = vmatpush.bf16.xpose.msra.mxu2 %v1213_v19  ;;  %1252 = vmatpush.bf16.msrb.mxu1 %v1243_v20 }
 0x64d   : > { %v1059_v22 = vpop.f32.mrf.mxu3 }
 0x64e   : > { %v1060_v23 = vadd.f32 %v1059_v22, %v726_v21  ;;  %v1716_v22 = vld [vmem:[%s2180_s9 + $0x8] sm:$0xff] }
 0x64f   : > { %1303 = vmatpush.bf16.msra.mxu3 %v1716_v22 }
 0x650   : > { %v1153_v24 = vpop.permute.xlu1 %1152  ;;  %v1063_v25 = vsel %vm730_vm0, %v1060_v23, -inf }
 0x651   : > { %1064 = vmax.xlane.f32.xlu1 %v1063_v25  ;;  %1657 = vmatmul.msk.bf16.vlgmr.msrb.gmra.mxu3 %vm730_vm0, %v1153_v24 }
 0x652   : > { %1659 = vmatmul.msk.bf16.vlgmr.msra.gmra.mxu2 %vm730_vm0, %v1206_v26 }
 0x655   : > { %v1061_v27 = vpop.f32.mrf.mxu3 }
 0x6c4   : > { %v1118_v28 = vpop.f32.mrf.mxu2  ;;  %v1065_v29 = vpop.xlane.xlu1 %1064 }
 0x6c5   : > { %v1119_v30 = vadd.f32 %v1118_v28, %v726_v21  ;;  %v1066_v31 = vsub.f32 %v1060_v23, %v1065_v29  ;;  %v1715_v23 = vld [vmem:[%s2180_s9] sm:$0xff] }
 0x6c6   : > { %1304 = vmatpush.bf16.msra.mxu3 %v1715_v23 }
 0x6c7   : > { %v1067_v32 = vmul.f32 1.442695, %v1066_v31  ;;  %v1122_v33 = vsel %vm730_vm0, %v1119_v30, -inf  ;;  %v1761_v31 = vld [vmem:[%s2181_s10] ss:$0 sm:$0xff] }
 0x6c8   : > { %1123 = vmax.xlane.f32.xlu0 %v1122_v33 }
 0x6c9   : > { %1788 = vpow2.f32 %v1067_v32 }
 0x6cc   : > { %v1120_v34 = vpop.f32.mrf.mxu2 }
 0x6cf   : > { %v1789_v35 = vpop.eup %1788 }
 0x6d0   : > { %v1069_v36 = vsel %vm730_vm0, %v1789_v35, 0.0 }
 0x6d1   : > { %1070 = vadd.xlane.f32.xlu2 %v1069_v36 }
 0x6d4   : > { %v1171_v37 = vpop.f32.mrf.mxu3 }
 0x6d5   : > { %v1172_v38 = vadd.f32 %v1171_v37, %v726_v21  ;;  %v1224_v39 = vpop.f32.mrf.mxu2 }
 0x6d6   : > { %v1225_v41 = vadd.f32 %v1224_v39, %v726_v21 }
 0x6d7   : > { %v1175_v40 = vsel %vm730_vm0, %v1172_v38, -inf }
 0x6d8   : > { %1176 = vmax.xlane.f32.xlu0 %v1175_v40  ;;  %v1228_v45 = vsel %vm730_vm0, %v1225_v41, -inf }
 0x6dc   : > { %v1173_v42 = vpop.f32.mrf.mxu3 }
 0x6dd   : > { %v1226_v44 = vpop.f32.mrf.mxu2  ;;  %v1718_v42 = vld [vmem:[%s2184_s13 + $0x8] sm:$0xff] }
 0x6de   : > { %v1726_v44 = vld [vmem:[%s2186_s15 + $0x38] sm:$0xff] }
 0x6df   : > { %1450 = vmatpush.bf16.msrb.mxu2 %v1726_v44 }
 0x6e0   : > { %1229 = vmax.xlane.f32.xlu0 %v1228_v45 }
 0x73b   : > { %v1124_v46 = vpop.xlane.xlu0 %1123 }
 0x73c   : > { %v1125_v2 = vsub.f32 %v1119_v30, %v1124_v46 }
 0x73e   : > { %v1126_v47 = vmul.f32 1.442695, %v1125_v2  ;;  %v1725_v2 = vld [vmem:[%s2186_s15 + $0x30] sm:$0xff] }
 0x73f   : > { %1451 = vmatpush.bf16.msrb.mxu2 %v1725_v2 }
 0x740   : > { %1790 = vpow2.f32 %v1126_v47 }
 0x744   : > { %v1071_v48 = vpop.xlane.xlu2 %1070 }
 0x745   : > { %1792 = vrcp.f32 %v1071_v48  ;;  %v1724_v48 = vld [vmem:[%s2186_s15 + $0x28] sm:$0xff] }
 0x746   : > { %v1791_v49 = vpop.eup %1790  ;;  %1452 = vmatpush.bf16.msrb.mxu2 %v1724_v48 }
 0x747   : > { %v1128_v50 = vsel %vm730_vm0, %v1791_v49, 0.0 }
 0x748   : > { %1129 = vadd.xlane.f32.xlu0 %v1128_v50 }
 0x74b   : > { %v1793_v51 = vpop.eup %1792  ;;  %v1177_v52 = vpop.xlane.xlu0 %1176 }
 0x74c   : > { %v1073_v53 = vmul.f32 %v1793_v51, %v1789_v35  ;;  %v1178_v54 = vsub.f32 %v1172_v38, %v1177_v52  ;;  %v1722_v52 = vld [vmem:[%s2186_s15 + $0x18] sm:$0xff] }
 0x74e   : > { %v1074_v55 = vpack.c.bf16 %v1073_v53, %v1073_v53  ;;  %v1179_v56 = vmul.f32 1.442695, %v1178_v54 }
 0x750   : > { %1794 = vpow2.f32 %v1179_v56  ;;  %1654 = vmatmul.msk.bf16.vlgmr.msra.gmra.mxu0 %vm730_vm0, %v1074_v55  ;;  %v1721_v55 = vld [vmem:[%s2186_s15 + $0x10] sm:$0xff] }
 0x751   : > { %1373 = vmatpush.bf16.msra.mxu0 %v1718_v42 }
 0x753   : > { %v1230_v57 = vpop.xlane.xlu0 %1229 }
 0x754   : > { %v1231_v58 = vsub.f32 %v1225_v41, %v1230_v57 }
 0x756   : > { %v1795_v59 = vpop.eup %1794  ;;  %v1232_v60 = vmul.f32 1.442695, %v1231_v58  ;;  %v1762_v58 = vld [vmem:[%s2182_s11] ss:$0 sm:$0xff] }
 0x757   : > { %v1181_v61 = vsel %vm730_vm0, %v1795_v59, 0.0 }
 0x758   : > { %1796 = vpow2.f32 %v1232_v60  ;;  %1182 = vadd.xlane.f32.xlu0 %v1181_v61  ;;  %v1763_v60 = vld [vmem:[%s2183_s12] ss:$0 sm:$0xff] }
 0x75e   : > { %v1797_v62 = vpop.eup %1796 }
 0x75f   : > { %v1234_v63 = vsel %vm730_vm0, %v1797_v62, 0.0 }
 0x760   : > { %1235 = vadd.xlane.f32.xlu0 %v1234_v63 }
 0x7bb   : > { %v1130_v0 = vpop.xlane.xlu0 %1129 }
 0x7bc   : > { %1798 = vrcp.f32 %v1130_v0 }
 0x7c2   : > { %v1799_v1 = vpop.eup %1798 }
 0x7c3   : > { %v1132_v3 = vmul.f32 %v1799_v1, %v1791_v49  ;;  %v1723_v49 = vld [vmem:[%s2186_s15 + $0x20] sm:$0xff]  ;;  %v1720_v1 = vld [vmem:[%s2186_s15 + $0x8] sm:$0xff] }
 0x7c4   : > { %1453 = vmatpush.bf16.msrb.mxu2 %v1723_v49 }
 0x7c5   : > { %v1133_v5 = vpack.c.bf16 %v1132_v3, %v1132_v3  ;;  %v1719_v3 = vld [vmem:[%s2186_s15] sm:$0xff] }
 0x7c7   : > { %1656 = vmatmul.msk.bf16.vlgmr.msra.gmra.mxu1 %vm730_vm0, %v1133_v5  ;;  %v1764_v5 = vld [vmem:[%s2185_s14] ss:$0 sm:$0xff] }
 0x7c8   : > { %1454 = vmatpush.bf16.msrb.mxu2 %v1722_v52 }
 0x7cb   : > { %v1183_v6 = vpop.xlane.xlu0 %1182 }
 0x7cc   : > { %1800 = vrcp.f32 %v1183_v6  ;;  %1455 = vmatpush.bf16.msrb.mxu2 %v1721_v55 }
 0x7cd   : > { %v1089_v7 = vpop.f32.mrf.mxu0 }
 0x7d0   : > { %1456 = vmatpush.bf16.msrb.mxu2 %v1720_v1 }
 0x7d2   : > { %v1801_v8 = vpop.eup %1800 }
 0x7d3   : > { %v1185_v9 = vmul.f32 %v1801_v8, %v1795_v59  ;;  %v1236_v10 = vpop.xlane.xlu0 %1235 }
 0x7d4   : > { %1802 = vrcp.f32 %v1236_v10  ;;  %1457 = vmatpush.bf16.msrb.mxu2 %v1719_v3 }
 0x7d5   : > { %v1186_v11 = vpack.c.bf16 %v1185_v9, %v1185_v9  ;;  %v1091_v12 = vpop.f32.mrf.mxu0 }
 0x7d7   : > { %1658 = vmatmul.msk.bf16.vlgmr.msrb.gmra.mxu0 %vm730_vm0, %v1186_v11  ;;  %v1765_v11 = vld [vmem:[%s2187_s16] ss:$0 sm:$0xff] }
 0x7da   : > { %v1803_v13 = vpop.eup %1802 }
 0x7db   : > { %v1238_v14 = vmul.f32 %v1803_v13, %v1797_v62 }
 0x7dd   : > { %v1239_v15 = vpack.c.bf16 %v1238_v14, %v1238_v14 }
 0x7df   : > { %1660 = vmatmul.msk.bf16.vlgmr.msrb.gmra.mxu1 %vm730_vm0, %v1239_v15 }
 0x844   : > { %v1148_v16 = vpop.f32.mrf.mxu1 }
 0x845   : > { %1259 = vrot.lane.b32.xlu1 %v1148_v16, %s1836_s27 }
 0x84c   : > { %v1150_v17 = vpop.f32.mrf.mxu1 }
 0x854   : > { %v1201_v18 = vpop.f32.mrf.mxu0 }
 0x855   : > { %1263 = vrot.lane.b32.xlu0 %v1201_v18, %s1837_s23 }
 0x85c   : > { %v1203_v19 = vpop.f32.mrf.mxu0  ;;  %v1254_v20 = vpop.f32.mrf.mxu1 }
 0x85d   : > { %1267 = vrot.lane.b32.xlu2 %v1254_v20, %s1835_s26 }
 0x864   : > { %v1256_v21 = vpop.f32.mrf.mxu1 }
 0x8b7   : > { %v1260_v24 = vpop.permute.xlu1 %1259  ;;  %v1268_v27 = vpop.permute.xlu2 %1267 }
 0x8b8   : > { %v1270_v25 = vsel %vm730_vm0, %v1089_v7, %v1260_v24 }
 0x8c7   : > { %v1264_v26 = vpop.permute.xlu0 %1263 }
 0x8c8   : > { %v1271_v28 = vsel %vm959_vm2, %v1270_v25, %v1264_v26 }
 0x8c9   : > { %v1272_v29 = vsel %vm961_vm3, %v1271_v28, %v1268_v27 }
 0x8ca   : > { %v1273_v30 = vpack.c.bf16 %v1272_v29, %v1272_v29 }
 0x8cc   : > { %1669 = vmatmul.msk.bf16.vlgmr.msra.gmra.mxu3 %vm984_vm4, %v1273_v30 }
 0x94f   : > { %v1306_v32 = vpop.f32.mrf.mxu3 }
 0x950   : > { %v1307_v33 = vadd.f32 %v1761_v31, %v1306_v32  ;;  %v1766_v31 = vld [vmem:[%s2188_s17] ss:$0 sm:$0xff] }
 0x952   : > { %v1310_v34 = vadd.f32 %v1307_v33, %v2048_v4  ;;  %v1717_v4 = vld [vmem:[%s2184_s13] sm:$0xff] }
 0x953   : > { %1374 = vmatpush.bf16.msra.mxu0 %v1717_v4 }
 0x954   : > { %v1311_v35 = vsel %vm984_vm4, %v1310_v34, 0.0 }
 0x955   : > { %1312 = vadd.xlane.f32.xlu1 %v1311_v35 }
 0x957   : > { %v1308_v36 = vpop.f32.mrf.mxu3 }
 0x9c8   : > { %v1313_v37 = vpop.xlane.xlu1 %1312 }
 0x9c9   : > { %v1314_v38 = vmul.f32 %v1313_v37, %v2030_v43 }
 0x9cb   : > { %v1315_v39 = vsub.f32 %v1310_v34, %v1314_v38 }
 0x9cd   : > { %v1316_v40 = vmul.f32 %v1315_v39, %v1315_v39 }
 0x9cf   : > { %v1317_v41 = vsel %vm984_vm4, %v1316_v40, 0.0 }
 0x9d0   : > { %1318 = vadd.xlane.f32.xlu0 %v1317_v41 }
 0xa43   : > { %v1319_v45 = vpop.xlane.xlu0 %1318 }
 0xa44   : > { %v1320_v46 = vmul.f32 %v1319_v45, %v2030_v43 }
 0xa46   : > { %v1321_v47 = vadd.f32 1e-05, %v1320_v46 }
 0xa48   : > { %1804 = vrsqrt.f32 %v1321_v47  ;;  %vm1328_vm10 = vweird.f32 %v1321_v47 }
 0xa4e   : > { %v1805_v50 = vpop.eup %1804 }
 0xa4f   : > { %v1323_v51 = vmul.f32 %v1805_v50, %v1321_v47  ;;  %vm1329_vm9 = vweird.f32 %v1805_v50 }
 0xa50   : > { %vm1330_vm11 = vmor %vm1328_vm10, %vm1329_vm9 }
 0xa51   : > { %v1324_v53 = vmul.f32 %v1805_v50, %v1323_v51 }
 0xa53   : > { %v1325_v54 = vmul.f32 0.5, %v1324_v53 }
 0xa55   : > { %v1326_v56 = vsub.f32 1.5, %v1325_v54 }
 0xa57   : > { %v1327_v57 = vmul.f32 %v1805_v50, %v1326_v56 }
 0xa59   : > { %v1331_v59 = vsel %vm1330_vm11, %v1805_v50, %v1327_v57 }
 0xa5a   : > { %v1332_v61 = vmul.f32 %v1331_v59, %v1315_v39 }
 0xa5c   : > { %v1337_v62 = vmul.f32 %v1762_v58, %v1332_v61 }
 0xa5e   : > { %v1342_v63 = vadd.f32 %v1763_v60, %v1337_v62 }
 0xa60   : > { %v1343_v0 = vpack.c.bf16 %v1342_v63, %v1342_v63 }
 0xa62   : > { %1678 = vmatmul.msk.bf16.vlgmr.msra.gmra.mxu0 %vm984_vm4, %v1343_v0 }
 0xadf   : > { %v1376_v6 = vpop.f32.mrf.mxu0 }
 0xae0   : > { %v1377_v7 = vadd.f32 %v1764_v5, %v1376_v6 }
 0xae2   : > { %v1380_v8 = vmax.f32 %v1377_v7, 0.0 }
 0xae4   : > { %v1381_v9 = vpack.c.bf16 %v1380_v8, %v1380_v8 }
 0xae6   : > { %1458 = vmatmul.bf16.vlgmr.msrb.gmra.mxu2 %v1381_v9 }
 0xae7   : > { %v1378_v10 = vpop.f32.mrf.mxu0 }
 0xb69   : > { %v1459_v12 = vpop.f32.mrf.mxu2 }
 0xb6a   : > { %v1460_v13 = vadd.f32 %v1765_v11, %v1459_v12 }
 0xb6c   : > { %v1463_v14 = vadd.f32 %v1460_v13, %v1342_v63 }
 0xb6e   : > { %v1464_v15 = vsel %vm984_vm4, %v1463_v14, 0.0 }
 0xb6f   : > { %1465 = vadd.xlane.f32.xlu2 %v1464_v15 }
 0xb71   : > { %v1461_v16 = vpop.f32.mrf.mxu2 }
 0xbe2   : > { %v1466_v17 = vpop.xlane.xlu2 %1465 }
 0xbe3   : > { %v1467_v18 = vmul.f32 %v1466_v17, %v2030_v43 }
 0xbe5   : > { %v1468_v19 = vsub.f32 %v1463_v14, %v1467_v18 }
 0xbe7   : > { %v1469_v20 = vmul.f32 %v1468_v19, %v1468_v19 }
 0xbe9   : > { %v1470_v21 = vsel %vm984_vm4, %v1469_v20, 0.0 }
 0xbea   : > { %1471 = vadd.xlane.f32.xlu1 %v1470_v21 }
 0xc5d   : > { %v1472_v22 = vpop.xlane.xlu1 %1471 }
 0xc5e   : > { %v1473_v23 = vmul.f32 %v1472_v22, %v2030_v43  ;;  %v1767_v43 = vld [vmem:[%s2189_s18] ss:$0 sm:$0xff] }
 0xc60   : > { %v1474_v24 = vadd.f32 1e-05, %v1473_v23 }
 0xc62   : > { %1806 = vrsqrt.f32 %v1474_v24  ;;  %vm1481_vm13 = vweird.f32 %v1474_v24 }
 0xc68   : > { %v1807_v25 = vpop.eup %1806 }
 0xc69   : > { %v1476_v26 = vmul.f32 %v1807_v25, %v1474_v24  ;;  %vm1482_vm12 = vweird.f32 %v1807_v25 }
 0xc6a   : > { %vm1483_vm14 = vmor %vm1481_vm13, %vm1482_vm12 }
 0xc6b   : > { %v1477_v27 = vmul.f32 %v1807_v25, %v1476_v26 }
 0xc6d   : > { %v1478_v28 = vmul.f32 0.5, %v1477_v27 }
 0xc6f   : > { %v1479_v29 = vsub.f32 1.5, %v1478_v28 }
 0xc71   : > { %v1480_v30 = vmul.f32 %v1807_v25, %v1479_v29 }
 0xc73   : > { %v1484_v32 = vsel %vm1483_vm14, %v1807_v25, %v1480_v30 }
 0xc74   : > { %v1485_v33 = vmul.f32 %v1484_v32, %v1468_v19 }
 0xc76   : > { %v1490_v34 = vmul.f32 %v1766_v31, %v1485_v33 }
 0xc78   : > { %v1495_v35 = vadd.f32 %v1767_v43, %v1490_v34 }
 0xc7a   : > { %1496 = vst.msk [vmem:[%s718_s28] sm:$0xff] %vm984_vm4, %v1495_v35 }
 0xc7b PF: > { %s29_s20 = sadd.s32 1, %s1830_s20   ;;  %s2201_s0 = smov %s1826_s30 }
 0xc7c   : > { %p26_p5 = scmp.ge.s32.totalorder %s29_s20, 4   ;;  %s2202_s30 = smov %s2204_s21 }
 0xc7e   :  { %28 = sbr.rel (!%p26_p5) target bundleno = 5 (0x5), region = 138 }

</bundles_post_ra>
